<compile_context>
chip_gen: v5e
topology: v5e:2x2
jax: 0.10.0
libtpu: 0.0.40
codegen_flags: <defaults>
</compile_context>

<pallas_src>
import jax
import jax.numpy as jnp
from jax.experimental import pallas as pl
from jax.experimental.pallas import tpu as pltpu


# ---------------------------------------------------------------------------
# Fused kernel
# ---------------------------------------------------------------------------

def _generative_kernel(y_ref, wmv_ref, bmv_ref,
                       z_ref, w1_ref, b1_ref, w2_ref, b2_ref, w3_ref, b3_ref,
                       muvar_ref, x_ref):
    """Fused p(z|y) + p(x|z) for one batch tile.

    muvar_ref columns [0, z_dim)       -> y_mean
    muvar_ref columns [z_dim, 2*z_dim) -> softplus(y_var pre-activation)
    """
    # ---- p(z|y): one matmul over the concatenated [Wmu | Wvar] ------------
    mv = jnp.dot(y_ref[...], wmv_ref[...],
                 preferred_element_type=jnp.float32) + bmv_ref[...]
    z_dim = mv.shape[-1] // 2
    # numerically stable softplus(x) = max(x, 0) + log1p(exp(-|x|))
    sp = jnp.maximum(mv, 0.0) + jnp.log1p(jnp.exp(-jnp.abs(mv)))
    col = jax.lax.broadcasted_iota(jnp.int32, mv.shape, dimension=1)
    muvar_ref[...] = jnp.where(col < z_dim, mv, sp).astype(muvar_ref.dtype)

    # ---- p(x|z): Linear(512) -> ReLU -> Linear(512) -> ReLU -> Linear -> Sigmoid
    h = jnp.dot(z_ref[...], w1_ref[...],
                preferred_element_type=jnp.float32) + b1_ref[...]
    h = jnp.maximum(h, 0.0).astype(w2_ref.dtype)          # bf16 into next MXU push
    h = jnp.dot(h, w2_ref[...],
                preferred_element_type=jnp.float32) + b2_ref[...]
    h = jnp.maximum(h, 0.0).astype(w3_ref.dtype)
    logits = jnp.dot(h, w3_ref[...],
                     preferred_element_type=jnp.float32) + b3_ref[...]
    x_ref[...] = jax.nn.sigmoid(logits).astype(x_ref.dtype)


# ---------------------------------------------------------------------------
# Wrapper
# ---------------------------------------------------------------------------

def generative_net_forward(z, y, params, *, max_tile_b=128):
    """Equivalent of GenerativeNet.forward: returns dict of y_mean, y_var, x_rec."""
    B, z_dim = z.shape
    y_dim = y.shape[1]
    hidden = params["w1"].shape[1]
    x_dim = params["w3"].shape[1]

    # Fuse mu/var params; cast matmul operands to bf16 (f32 accumulation in-kernel).
    w_muvar = jnp.concatenate([params["w_mu"], params["w_var"]],
                              axis=1).astype(jnp.bfloat16)
    b_muvar = jnp.concatenate([params["b_mu"], params["b_var"]],
                              axis=1).astype(jnp.float32)
    w1 = params["w1"].astype(jnp.bfloat16)
    w2 = params["w2"].astype(jnp.bfloat16)
    w3 = params["w3"].astype(jnp.bfloat16)
    b1 = params["b1"].astype(jnp.float32)
    b2 = params["b2"].astype(jnp.float32)
    b3 = params["b3"].astype(jnp.float32)
    zb = z.astype(jnp.bfloat16)
    yb = y.astype(jnp.bfloat16)

    # Batch tile: whole batch if small, otherwise pipelined 128-row tiles.
    tb = B if B <= max_tile_b else max_tile_b
    grid = (pl.cdiv(B, tb),)

    def act_spec(feat):
        # batch-tiled activation / output block
        return pl.BlockSpec((tb, feat), lambda i: (i, 0))

    def resident_spec(shape):
        # same block index for every grid step -> fetched once, stays in VMEM
        return pl.BlockSpec(shape, lambda i: (0, 0))

    muvar, x_rec = pl.pallas_call(
        _generative_kernel,
        out_shape=(jax.ShapeDtypeStruct((B, 2 * z_dim), jnp.float32),
                   jax.ShapeDtypeStruct((B, x_dim), jnp.float32)),
        grid=grid,
        in_specs=[act_spec(y_dim),
                  resident_spec(w_muvar.shape), resident_spec(b_muvar.shape),
                  act_spec(z_dim),
                  resident_spec(w1.shape), resident_spec(b1.shape),
                  resident_spec(w2.shape), resident_spec(b2.shape),
                  resident_spec(w3.shape), resident_spec(b3.shape)],
        out_specs=(act_spec(2 * z_dim), act_spec(x_dim)),
        compiler_params=pltpu.CompilerParams(
            dimension_semantics=("parallel",)),
    )(yb, w_muvar, b_muvar, zb, w1, b1, w2, b2, w3, b3)

    return {"y_mean": muvar[:, :z_dim],
            "y_var": muvar[:, z_dim:],
            "x_rec": x_rec}


# ---------------------------------------------------------------------------
# Deterministic parameter init (synthetic, matches nn.Linear shapes)
# ---------------------------------------------------------------------------

def init_params(key, x_dim, z_dim, y_dim, hidden=512):
    ks = jax.random.split(key, 10)

    def linear(kw, kb, fan_in, fan_out):
        # uniform(-1/sqrt(fan_in), 1/sqrt(fan_in)), like PyTorch default
        bound = 1.0 / jnp.sqrt(fan_in)
        w = jax.random.uniform(kw, (fan_in, fan_out), jnp.float32, -bound, bound)
        b = jax.random.uniform(kb, (1, fan_out), jnp.float32, -bound, bound)
        return w, b

    w_mu, b_mu = linear(ks[0], ks[1], y_dim, z_dim)
    w_var, b_var = linear(ks[2], ks[3], y_dim, z_dim)
    w1, b1 = linear(ks[4], ks[5], z_dim, hidden)
    w2, b2 = linear(ks[6], ks[7], hidden, hidden)
    w3, b3 = linear(ks[8], ks[9], hidden, x_dim)
    return {"w_mu": w_mu, "b_mu": b_mu, "w_var": w_var, "b_var": b_var,
            "w1": w1, "b1": b1, "w2": w2, "b2": b2, "w3": w3, "b3": b3}


# ---------------------------------------------------------------------------
# Main
# ---------------------------------------------------------------------------

if __name__ == "__main__":
    batch, x_dim, z_dim, y_dim = 8, 256, 64, 16

    key = jax.random.PRNGKey(0)
    k_p, k_z, k_y = jax.random.split(key, 3)

    params = init_params(k_p, x_dim, z_dim, y_dim)
    z = jax.random.normal(k_z, (batch, z_dim), jnp.float32)
    y = jax.random.normal(k_y, (batch, y_dim), jnp.float32)

    out = generative_net_forward(z, y, params)
    jax.block_until_ready(out)

    # Pure-JAX reference with the SAME bf16 operand casts (f32 accumulation).
    def bf(x):
        return x.astype(jnp.bfloat16).astype(jnp.float32)

    ref_mu = bf(y) @ bf(params["w_mu"]) + params["b_mu"]
    ref_var = jax.nn.softplus(bf(y) @ bf(params["w_var"]) + params["b_var"])
    h = jax.nn.relu(bf(z) @ bf(params["w1"]) + params["b1"])
    h = jax.nn.relu(bf(h) @ bf(params["w2"]) + params["b2"])
    ref_x = jax.nn.sigmoid(bf(h) @ bf(params["w3"]) + params["b3"])

    assert out["y_mean"].shape == (batch, z_dim)
    assert out["y_var"].shape == (batch, z_dim)
    assert out["x_rec"].shape == (batch, x_dim)
    assert jnp.allclose(out["y_mean"], ref_mu, atol=5e-3, rtol=5e-3)
    assert jnp.allclose(out["y_var"], ref_var, atol=5e-3, rtol=5e-3)
    assert jnp.allclose(out["x_rec"], ref_x, atol=5e-3, rtol=5e-3)

    print("KERNEL_OK")
</pallas_src>

<mosaic_0001>
module attributes {stable_mosaic.version = 11 : i64} {
  func.func @_generative_kernel(%arg0: i32, %arg1: memref<8x16xbf16, #tpu.memory_space<vmem>>, %arg2: memref<16x128xbf16, #tpu.memory_space<vmem>>, %arg3: memref<1x128xf32, #tpu.memory_space<vmem>>, %arg4: memref<8x64xbf16, #tpu.memory_space<vmem>>, %arg5: memref<64x512xbf16, #tpu.memory_space<vmem>>, %arg6: memref<1x512xf32, #tpu.memory_space<vmem>>, %arg7: memref<512x512xbf16, #tpu.memory_space<vmem>>, %arg8: memref<1x512xf32, #tpu.memory_space<vmem>>, %arg9: memref<512x256xbf16, #tpu.memory_space<vmem>>, %arg10: memref<1x256xf32, #tpu.memory_space<vmem>>, %arg11: memref<8x128xf32, #tpu.memory_space<vmem>>, %arg12: memref<8x256xf32, #tpu.memory_space<vmem>>) attributes {dimension_semantics = [#tpu.dimension_semantics<parallel>], iteration_bounds = array<i64: 1>, scalar_prefetch = 0 : i64, scratch_operands = 0 : i64, tpu.core_type = #tpu.core_type<tc>, window_params = [{transform_indices = @transform_0, window_bounds = array<i64: 8, 16>}, {pipeline_mode = #tpu.pipeline_mode<synchronous>, transform_indices = @transform_1, window_bounds = array<i64: 16, 128>}, {pipeline_mode = #tpu.pipeline_mode<synchronous>, transform_indices = @transform_2, window_bounds = array<i64: 1, 128>}, {transform_indices = @transform_3, window_bounds = array<i64: 8, 64>}, {pipeline_mode = #tpu.pipeline_mode<synchronous>, transform_indices = @transform_4, window_bounds = array<i64: 64, 512>}, {pipeline_mode = #tpu.pipeline_mode<synchronous>, transform_indices = @transform_5, window_bounds = array<i64: 1, 512>}, {pipeline_mode = #tpu.pipeline_mode<synchronous>, transform_indices = @transform_6, window_bounds = array<i64: 512, 512>}, {pipeline_mode = #tpu.pipeline_mode<synchronous>, transform_indices = @transform_7, window_bounds = array<i64: 1, 512>}, {pipeline_mode = #tpu.pipeline_mode<synchronous>, transform_indices = @transform_8, window_bounds = array<i64: 512, 256>}, {pipeline_mode = #tpu.pipeline_mode<synchronous>, transform_indices = @transform_9, window_bounds = array<i64: 1, 256>}, {transform_indices = @transform_10, window_bounds = array<i64: 8, 128>}, {transform_indices = @transform_11, window_bounds = array<i64: 8, 256>}]} {
    %c0 = arith.constant 0 : index
    %c0_0 = arith.constant 0 : index
    %0 = vector.load %arg1[%c0, %c0_0] : memref<8x16xbf16, #tpu.memory_space<vmem>>, vector<8x16xbf16>
    %c0_1 = arith.constant 0 : index
    %c0_2 = arith.constant 0 : index
    %1 = vector.load %arg2[%c0_1, %c0_2] : memref<16x128xbf16, #tpu.memory_space<vmem>>, vector<16x128xbf16>
    %cst = arith.constant dense<0.000000e+00> : vector<8x128xf32>
    %2 = tpu.matmul %0, %1, %cst {dimension_numbers = #tpu.dot_dimension_numbers<[1], [0], [0], [1], [0, 0, 1, 1], [], []>} : vector<8x16xbf16>, vector<16x128xbf16>, vector<8x128xf32> -> vector<8x128xf32>
    %c0_3 = arith.constant 0 : index
    %c0_4 = arith.constant 0 : index
    %3 = vector.load %arg3[%c0_3, %c0_4] : memref<1x128xf32, #tpu.memory_space<vmem>>, vector<1x128xf32>
    %4 = vector.broadcast %3 : vector<1x128xf32> to vector<8x128xf32>
    %5 = arith.addf %2, %4 : vector<8x128xf32>
    %cst_5 = arith.constant 0.000000e+00 : f32
    %6 = vector.broadcast %cst_5 : f32 to vector<8x128xf32>
    %7 = arith.maximumf %5, %6 : vector<8x128xf32>
    %8 = math.absf %5 : vector<8x128xf32>
    %cst_6 = arith.constant 0.000000e+00 : f32
    %9 = vector.broadcast %cst_6 : f32 to vector<8x128xf32>
    %10 = arith.subf %9, %8 : vector<8x128xf32>
    %11 = math.exp %10 : vector<8x128xf32>
    %12 = math.log1p %11 : vector<8x128xf32>
    %13 = arith.addf %7, %12 : vector<8x128xf32>
    %14 = tpu.iota {dimensions = array<i32: 1>} : vector<8x128xi32>
    %c64_i32 = arith.constant 64 : i32
    %15 = vector.broadcast %c64_i32 : i32 to vector<8x128xi32>
    %16 = arith.cmpi slt, %14, %15 : vector<8x128xi32>
    %17 = arith.select %16, %5, %13 : vector<8x128xi1>, vector<8x128xf32>
    %c0_7 = arith.constant 0 : index
    %c0_8 = arith.constant 0 : index
    %18 = vector.load %arg11[%c0_7, %c0_8] : memref<8x128xf32, #tpu.memory_space<vmem>>, vector<8x128xf32>
    tpu.vector_store %arg11[%c0_7, %c0_8], %17 {strides = array<i32>} : memref<8x128xf32, #tpu.memory_space<vmem>>, vector<8x128xf32>,
    %c0_9 = arith.constant 0 : index
    %c0_10 = arith.constant 0 : index
    %19 = vector.load %arg4[%c0_9, %c0_10] : memref<8x64xbf16, #tpu.memory_space<vmem>>, vector<8x64xbf16>
    %c0_11 = arith.constant 0 : index
    %c0_12 = arith.constant 0 : index
    %20 = vector.load %arg5[%c0_11, %c0_12] : memref<64x512xbf16, #tpu.memory_space<vmem>>, vector<64x512xbf16>
    %cst_13 = arith.constant dense<0.000000e+00> : vector<8x512xf32>
    %21 = tpu.matmul %19, %20, %cst_13 {dimension_numbers = #tpu.dot_dimension_numbers<[1], [0], [0], [1], [0, 0, 1, 1], [], []>} : vector<8x64xbf16>, vector<64x512xbf16>, vector<8x512xf32> -> vector<8x512xf32>
    %c0_14 = arith.constant 0 : index
    %c0_15 = arith.constant 0 : index
    %22 = vector.load %arg6[%c0_14, %c0_15] : memref<1x512xf32, #tpu.memory_space<vmem>>, vector<1x512xf32>
    %23 = vector.broadcast %22 : vector<1x512xf32> to vector<8x512xf32>
    %24 = arith.addf %21, %23 : vector<8x512xf32>
    %cst_16 = arith.constant 0.000000e+00 : f32
    %25 = vector.broadcast %cst_16 : f32 to vector<8x512xf32>
    %26 = arith.maximumf %24, %25 : vector<8x512xf32>
    %27 = arith.truncf %26 : vector<8x512xf32> to vector<8x512xbf16>
    %c0_17 = arith.constant 0 : index
    %c0_18 = arith.constant 0 : index
    %28 = vector.load %arg7[%c0_17, %c0_18] : memref<512x512xbf16, #tpu.memory_space<vmem>>, vector<512x512xbf16>
    %cst_19 = arith.constant dense<0.000000e+00> : vector<8x512xf32>
    %29 = tpu.matmul %27, %28, %cst_19 {dimension_numbers = #tpu.dot_dimension_numbers<[1], [0], [0], [1], [0, 0, 1, 1], [], []>} : vector<8x512xbf16>, vector<512x512xbf16>, vector<8x512xf32> -> vector<8x512xf32>
    %c0_20 = arith.constant 0 : index
    %c0_21 = arith.constant 0 : index
    %30 = vector.load %arg8[%c0_20, %c0_21] : memref<1x512xf32, #tpu.memory_space<vmem>>, vector<1x512xf32>
    %31 = vector.broadcast %30 : vector<1x512xf32> to vector<8x512xf32>
    %32 = arith.addf %29, %31 : vector<8x512xf32>
    %cst_22 = arith.constant 0.000000e+00 : f32
    %33 = vector.broadcast %cst_22 : f32 to vector<8x512xf32>
    %34 = arith.maximumf %32, %33 : vector<8x512xf32>
    %35 = arith.truncf %34 : vector<8x512xf32> to vector<8x512xbf16>
    %c0_23 = arith.constant 0 : index
    %c0_24 = arith.constant 0 : index
    %36 = vector.load %arg9[%c0_23, %c0_24] : memref<512x256xbf16, #tpu.memory_space<vmem>>, vector<512x256xbf16>
    %cst_25 = arith.constant dense<0.000000e+00> : vector<8x256xf32>
    %37 = tpu.matmul %35, %36, %cst_25 {dimension_numbers = #tpu.dot_dimension_numbers<[1], [0], [0], [1], [0, 0, 1, 1], [], []>} : vector<8x512xbf16>, vector<512x256xbf16>, vector<8x256xf32> -> vector<8x256xf32>
    %c0_26 = arith.constant 0 : index
    %c0_27 = arith.constant 0 : index
    %38 = vector.load %arg10[%c0_26, %c0_27] : memref<1x256xf32, #tpu.memory_space<vmem>>, vector<1x256xf32>
    %39 = vector.broadcast %38 : vector<1x256xf32> to vector<8x256xf32>
    %40 = arith.addf %37, %39 : vector<8x256xf32>
    %41 = arith.negf %40 : vector<8x256xf32>
    %42 = math.exp %41 : vector<8x256xf32>
    %cst_28 = arith.constant 1.000000e+00 : f32
    %43 = vector.broadcast %cst_28 : f32 to vector<8x256xf32>
    %44 = arith.addf %43, %42 : vector<8x256xf32>
    %45 = arith.divf %43, %44 : vector<8x256xf32>
    %c0_29 = arith.constant 0 : index
    %c0_30 = arith.constant 0 : index
    %46 = vector.load %arg12[%c0_29, %c0_30] : memref<8x256xf32, #tpu.memory_space<vmem>>, vector<8x256xf32>
    tpu.vector_store %arg12[%c0_29, %c0_30], %45 {strides = array<i32>} : memref<8x256xf32, #tpu.memory_space<vmem>>, vector<8x256xf32>,
    return
  }
  func.func @transform_0(%arg0: i32) -> (i32, i32) {
    %c0_i32 = arith.constant 0 : i32
    %c0_i32_0 = arith.constant 0 : i32
    return %arg0, %c0_i32 : i32, i32
  }
  func.func @transform_1(%arg0: i32) -> (i32, i32) {
    %c0_i32 = arith.constant 0 : i32
    %c0_i32_0 = arith.constant 0 : i32
    %c0_i32_1 = arith.constant 0 : i32
    return %c0_i32, %c0_i32_0 : i32, i32
  }
  func.func @transform_2(%arg0: i32) -> (i32, i32) {
    %c0_i32 = arith.constant 0 : i32
    %c0_i32_0 = arith.constant 0 : i32
    %c0_i32_1 = arith.constant 0 : i32
    return %c0_i32, %c0_i32_0 : i32, i32
  }
  func.func @transform_3(%arg0: i32) -> (i32, i32) {
    %c0_i32 = arith.constant 0 : i32
    %c0_i32_0 = arith.constant 0 : i32
    return %arg0, %c0_i32 : i32, i32
  }
  func.func @transform_4(%arg0: i32) -> (i32, i32) {
    %c0_i32 = arith.constant 0 : i32
    %c0_i32_0 = arith.constant 0 : i32
    %c0_i32_1 = arith.constant 0 : i32
    return %c0_i32, %c0_i32_0 : i32, i32
  }
  func.func @transform_5(%arg0: i32) -> (i32, i32) {
    %c0_i32 = arith.constant 0 : i32
    %c0_i32_0 = arith.constant 0 : i32
    %c0_i32_1 = arith.constant 0 : i32
    return %c0_i32, %c0_i32_0 : i32, i32
  }
  func.func @transform_6(%arg0: i32) -> (i32, i32) {
    %c0_i32 = arith.constant 0 : i32
    %c0_i32_0 = arith.constant 0 : i32
    %c0_i32_1 = arith.constant 0 : i32
    return %c0_i32, %c0_i32_0 : i32, i32
  }
  func.func @transform_7(%arg0: i32) -> (i32, i32) {
    %c0_i32 = arith.constant 0 : i32
    %c0_i32_0 = arith.constant 0 : i32
    %c0_i32_1 = arith.constant 0 : i32
    return %c0_i32, %c0_i32_0 : i32, i32
  }
  func.func @transform_8(%arg0: i32) -> (i32, i32) {
    %c0_i32 = arith.constant 0 : i32
    %c0_i32_0 = arith.constant 0 : i32
    %c0_i32_1 = arith.constant 0 : i32
    return %c0_i32, %c0_i32_0 : i32, i32
  }
  func.func @transform_9(%arg0: i32) -> (i32, i32) {
    %c0_i32 = arith.constant 0 : i32
    %c0_i32_0 = arith.constant 0 : i32
    %c0_i32_1 = arith.constant 0 : i32
    return %c0_i32, %c0_i32_0 : i32, i32
  }
  func.func @transform_10(%arg0: i32) -> (i32, i32) {
    %c0_i32 = arith.constant 0 : i32
    %c0_i32_0 = arith.constant 0 : i32
    return %arg0, %c0_i32 : i32, i32
  }
  func.func @transform_11(%arg0: i32) -> (i32, i32) {
    %c0_i32 = arith.constant 0 : i32
    %c0_i32_0 = arith.constant 0 : i32
    return %arg0, %c0_i32 : i32, i32
  }
}

</mosaic_0001>

<bundles_post_ra>
// kernel: tpu_custom_call.1
= control target key start
LH: loop header
LB: loop body
LE: loop exit
PB: predicated region body
PF: predicated region fallthrough
CT: control target
= control target key end

     0   :  { %17 = vsyncpa [#allocation3], 0  ;;  %s3437_s0 = inlined_call_operand.hbm [shape: bf16[8,16], index: 0, kind: input, shape index: {}]   ;;  %s3438_s1 = inlined_call_operand.hbm [shape: bf16[16,128], index: 1, kind: input, shape index: {}]   ;;  %s3439_s2 = inlined_call_operand.hbm [shape: f32[1,128], index: 2, kind: input, shape index: {}]   ;;  %s3440_s3 = inlined_call_operand.hbm [shape: bf16[8,64], index: 3, kind: input, shape index: {}]   ;;  %s3441_s4 = inlined_call_operand.hbm [shape: bf16[64,512], index: 4, kind: input, shape index: {}]   ;;  %s3442_s5 = inlined_call_operand.vmem [shape: f32[1,512], index: 5, kind: input, shape index: {}]   ;;  %s3443_s6 = inlined_call_operand.hbm [shape: bf16[512,512], index: 6, kind: input, shape index: {}]   ;;  %s3444_s7 = inlined_call_operand.hbm [shape: f32[1,512], index: 7, kind: input, shape index: {}]   ;;  %s3445_s8 = inlined_call_operand.hbm [shape: bf16[512,256], index: 8, kind: input, shape index: {}]   ;;  %s3446_s9 = inlined_call_operand.vmem [shape: f32[1,256], index: 9, kind: input, shape index: {}]   ;;  %s3447_s10 = inlined_call_operand.hbm [shape: f32[8,128], index: 10, kind: output, shape index: {0}]   ;;  %s3448_s11 = inlined_call_operand.hbm [shape: f32[8,256], index: 11, kind: output, shape index: {1}]  }
   0x1   :  { %18 = vsyncpa [#allocation6], 0 }
   0x2   :  { %19 = vsyncpa [#allocation9], 0 }
   0x3   :  { %20 = vsyncpa [#allocation12], 0 }
   0x4   :  { %21 = vsyncpa [#allocation15], 0 }
   0x5   :  { %22 = vsyncpa [#allocation4], 0  ;;  %s39_s19 = sshll.u32 %s3438_s1, 4  ;;  %s40_s19 = int_to_ptr.hbm [resolvable:$true] %s39_s19 }
   0x6   :  { %23 = vsyncpa [#allocation18], 0  ;;  %s3278_s20 = smov [#allocation5]   ;;  %s64_s24 = sshll.u32 %s3440_s3, 4  ;;  %s65_s24 = int_to_ptr.hbm [resolvable:$true] %s64_s24 }
   0x7   :  { %s41_s21 = sshll.u32 %s3278_s20, 4  ;;  %s3279_s25 = smov 64   ;;  %s42_s21 = int_to_ptr.vmem [resolvable:$true] %s41_s21 }
   0x8   :  { %s3280_s26 = smov 4   ;;  %s3281_s27 = smov [#allocation8]  }
   0x9   :  { %47 = dma.hbm_to_vmem [thread:$0]  %s40_s19, 128, %s42_s21, [#allocation6], %s3279_s25, %s3279_s25, %s3280_s26  }
   0xa   :  { %s66_s28 = sshll.u32 %s3281_s27, 4  ;;  %s89_s1 = sshll.u32 %s3443_s6, 4  ;;  %s67_s28 = int_to_ptr.vmem [resolvable:$true] %s66_s28  ;;  %s90_s1 = int_to_ptr.hbm [resolvable:$true] %s89_s1 }
   0xb   :  { %69 = dma.hbm_to_vmem [thread:$0]  %s65_s24, 64, %s67_s28, [#allocation9]  }
   0xc   :  { %s3282_s12 = smov [#allocation11]   ;;  %s29_s3 = sshll.u32 %s3437_s0, 4  ;;  %s30_s3 = int_to_ptr.hbm [resolvable:$true] %s29_s3 }
   0xd   :  { %s91_s13 = sshll.u32 %s3282_s12, 4  ;;  %s3283_s16 = smov 256   ;;  %s92_s13 = int_to_ptr.vmem [resolvable:$true] %s91_s13 }
   0xe   :  { %s3284_s17 = smov 16   ;;  %s3285_s18 = smov [#allocation2]  }
   0xf   :  { %97 = dma.hbm_to_vmem [thread:$0]  %s90_s1, 16384, %s92_s13, [#allocation12], %s3283_s16, %s3283_s16, %s3284_s17  }
  0x10   :  { %s31_s19 = sshll.u32 %s3285_s18, 4  ;;  %s53_s22 = sshll.u32 %s3439_s2, 4  ;;  %s32_s19 = int_to_ptr.vmem [resolvable:$true] %s31_s19  ;;  %s54_s22 = int_to_ptr.hbm [resolvable:$true] %s53_s22 }
  0x11   :  { %34 = dma.hbm_to_vmem [thread:$0]  %s30_s3, 64, %s32_s19, [#allocation3]  }
  0x12   :  { %s74_s24 = sshll.u32 %s3441_s4, 4  ;;  %s3286_s25 = smov [#allocation7]   ;;  %s75_s24 = int_to_ptr.hbm [resolvable:$true] %s74_s24 }
  0x13   :  { %s55_s26 = sshll.u32 %s3286_s25, 4  ;;  %s3287_s0 = smov [#allocation10]   ;;  %s56_s26 = int_to_ptr.vmem [resolvable:$true] %s55_s26 }
  0x14   :  { %58 = dma.hbm_to_vmem [thread:$0]  %s54_s22, 16, %s56_s26, [#allocation6]  }
  0x15   :  { %s76_s27 = sshll.u32 %s3287_s0, 4  ;;  %s103_s30 = sshll.u32 %s3444_s7, 4  ;;  %s77_s27 = int_to_ptr.vmem [resolvable:$true] %s76_s27  ;;  %s104_s30 = int_to_ptr.hbm [resolvable:$true] %s103_s30 }
  0x16   :  { %82 = dma.hbm_to_vmem [thread:$0]  %s75_s24, 2048, %s77_s27, [#allocation9], %s3283_s16, %s3283_s16, %s3284_s17  }
  0x17   :  { %s113_s12 = sshll.u32 %s3445_s8, 4  ;;  %s3288_s13 = smov [#allocation13]   ;;  %s114_s12 = int_to_ptr.hbm [resolvable:$true] %s113_s12 }
  0x18   :  { %s105_s4 = sshll.u32 %s3288_s13, 4  ;;  %s3289_s14 = smov [#allocation14]   ;;  %s106_s4 = int_to_ptr.vmem [resolvable:$true] %s105_s4 }
  0x19   :  { %108 = dma.hbm_to_vmem [thread:$0]  %s104_s30, 64, %s106_s4, [#allocation12]  }
  0x1a   :  { %s115_s15 = sshll.u32 %s3289_s14, 4  ;;  %s3290_s3 = smov 128   ;;  %s116_s15 = int_to_ptr.vmem [resolvable:$true] %s115_s15 }
  0x1b   :  { %s3291_s18 = smov 8  }
  0x1c   :  { %121 = dma.hbm_to_vmem [thread:$0]  %s114_s12, 8192, %s116_s15, [#allocation15], %s3290_s3, %s3290_s3, %s3291_s18  }
  0x1d   :  { %3264 = dma.done.wait [#allocation3], 64  }
  0x1e   :  { %3265 = vsyncadd [#allocation3], 4294967232 }
  0x1f   :  { %3266 = dma.done.wait [#allocation6], 144  }
  0x20   :  { %3267 = vsyncadd [#allocation6], 4294967152 }
  0x21   :  { %3268 = dma.done.wait [#allocation9], 2112  }
  0x22   :  { %3269 = vsyncadd [#allocation9], 4294965184 }
  0x23   :  { %3270 = dma.done.wait [#allocation12], 16448  }
  0x24   :  { %3271 = vsyncadd [#allocation12], 4294950848 }
  0x25   :  { %3272 = dma.done.wait [#allocation15], 8192  }
  0x26   :  { %3273 = vsyncadd [#allocation15], 4294959104  ;;  %v2786_v0 = vld [vmem:[#allocation5] sm:$0xff]  ;;  %v1998_v1 = vld [vmem:[#allocation10 + $0x60] sm:$0xf]  ;;  %vm170_vm0 = vcmask 130048  }
  0x27   :  { %v2801_v2 = vld [vmem:[#allocation10 + $0x6c] sm:$0xf0]  ;;  %v2799_v4 = vld [vmem:[#allocation10 + $0x64] sm:$0xf]  ;;  %v2000_v5 = vld [vmem:[#allocation10 + $0x70] sm:$0xf0]  ;;  %181 = vmatpush.bf16.msra.mxu0 %v2786_v0 }
  0x28   :  { %v1999_v3 = vor.u32 %v2801_v2, %v1998_v1  ;;  %v2006_v6 = vld [vmem:[#allocation10 + $0x68] sm:$0xf]  ;;  %v2003_v7 = vor.u32 %v2799_v4, %v2000_v5  ;;  %v2802_v8 = vld [vmem:[#allocation10 + $0x74] sm:$0xf0]  ;;  %v157_v9 = vld [vmem:[#allocation2] sm:$0xf] }
  0x29   :  { %v1982_v10 = vld [vmem:[#allocation10 + $0x40] sm:$0xf]  ;;  %v2007_v11 = vor.u32 %v2802_v8, %v2006_v6  ;;  %v2797_v12 = vld [vmem:[#allocation10 + $0x4c] sm:$0xf0]  ;;  %v2795_v13 = vld [vmem:[#allocation10 + $0x44] sm:$0xf] }
  0x2a   :  { %322 = vmatpush.bf16.msra.mxu1 %v1999_v3  ;;  %v1984_v14 = vld [vmem:[#allocation10 + $0x50] sm:$0xf0]  ;;  %335 = vmatpush.bf16.msra.mxu2 %v2003_v7  ;;  %v1983_v15 = vor.u32 %v2797_v12, %v1982_v10  ;;  %v1990_v17 = vld [vmem:[#allocation10 + $0x48] sm:$0xf]  ;;  %v2798_v18 = vld [vmem:[#allocation10 + $0x54] sm:$0xf0] }
  0x2b   :  { %v1987_v16 = vor.u32 %v2795_v13, %v1984_v14  ;;  %v2800_v19 = vld [vmem:[#allocation10 + $0x6c] sm:$0xf]  ;;  %348 = vmatpush.bf16.msra.mxu3 %v2007_v11  ;;  %1947 = vmatmul.msk.bf16.vlgmr.msra.gmra.mxu0 %vm170_vm0, %v157_v9  ;;  %v1991_v20 = vor.u32 %v2798_v18, %v1990_v17  ;;  %v2008_v21 = vld [vmem:[#allocation10 + $0x78] sm:$0xf0]  ;;  %v1966_v22 = vld [vmem:[#allocation10 + $0x20] sm:$0xf] }
  0x2c   :  { %v2793_v23 = vld [vmem:[#allocation10 + $0x2c] sm:$0xf0]  ;;  %v2011_v24 = vor.u32 %v2800_v19, %v2008_v21  ;;  %v2791_v25 = vld [vmem:[#allocation10 + $0x24] sm:$0xf]  ;;  %v1968_v26 = vld [vmem:[#allocation10 + $0x30] sm:$0xf0] }
  0x2d   :  { %v1974_v27 = vld [vmem:[#allocation10 + $0x28] sm:$0xf]  ;;  %v1967_v28 = vor.u32 %v2793_v23, %v1966_v22  ;;  %v2794_v29 = vld [vmem:[#allocation10 + $0x34] sm:$0xf0]  ;;  %v2796_v30 = vld [vmem:[#allocation10 + $0x4c] sm:$0xf]  ;;  %v1971_v32 = vor.u32 %v2791_v25, %v1968_v26 }
  0x2e   :  { %323 = vmatpush.bf16.msra.mxu1 %v1983_v15  ;;  %v1992_v31 = vld [vmem:[#allocation10 + $0x58] sm:$0xf0]  ;;  %336 = vmatpush.bf16.msra.mxu2 %v1987_v16  ;;  %v1950_v34 = vld [vmem:[#allocation10] sm:$0xf]  ;;  %v2789_v35 = vld [vmem:[#allocation10 + $0xc] sm:$0xf0]  ;;  %v1975_v36 = vor.u32 %v2794_v29, %v1974_v27 }
  0x2f   :  { %361 = vmatpush.bf16.msrb.mxu0 %v2011_v24  ;;  %v1995_v33 = vor.u32 %v2796_v30, %v1992_v31  ;;  %349 = vmatpush.bf16.msra.mxu3 %v1991_v20  ;;  %v2787_v37 = vld [vmem:[#allocation10 + $0x4] sm:$0xf]  ;;  %v1952_v38 = vld [vmem:[#allocation10 + $0x10] sm:$0xf0]  ;;  %v1958_v39 = vld [vmem:[#allocation10 + $0x8] sm:$0xf]  ;;  %v1951_v43 = vor.u32 %v2789_v35, %v1950_v34 }
  0x30   :  { %v2790_v40 = vld [vmem:[#allocation10 + $0x14] sm:$0xf0]  ;;  %v2792_v41 = vld [vmem:[#allocation10 + $0x2c] sm:$0xf]  ;;  %v1976_v42 = vld [vmem:[#allocation10 + $0x38] sm:$0xf0]  ;;  %v1955_v47 = vor.u32 %v2787_v37, %v1952_v38 }
  0x31   :  { %v2788_v44 = vld [vmem:[#allocation10 + $0xc] sm:$0xf]  ;;  %v1960_v45 = vld [vmem:[#allocation10 + $0x18] sm:$0xf0]  ;;  %v2130_v46 = vld [vmem:[#allocation11 + $0xe0] sm:$0xf]  ;;  %v1979_v48 = vor.u32 %v2792_v41, %v1976_v42  ;;  %v1959_v52 = vor.u32 %v2790_v40, %v1958_v39 }
  0x32   :  { %324 = vmatpush.bf16.msra.mxu1 %v1967_v28  ;;  %337 = vmatpush.bf16.msra.mxu2 %v1971_v32  ;;  %v2833_v49 = vld [vmem:[#allocation11 + $0xec] sm:$0xf0]  ;;  %v2114_v50 = vld [vmem:[#allocation11 + $0xc0] sm:$0xf]  ;;  %v207_v60 = vld [vmem:[#allocation8] sm:$0xf]  ;;  %v1963_v63 = vor.u32 %v2788_v44, %v1960_v45 }
  0x33   :  { %362 = vmatpush.bf16.msrb.mxu0 %v1995_v33  ;;  %v2829_v51 = vld [vmem:[#allocation11 + $0xcc] sm:$0xf0]  ;;  %350 = vmatpush.bf16.msra.mxu3 %v1975_v36  ;;  %v2131_v53 = vor.u32 %v2833_v49, %v2130_v46  ;;  %v2514_v54 = vld [vmem:[#allocation11 + $0x3e0] sm:$0xf]  ;;  %vm314_vm1 = vcmask 523264   ;;  %s1913_s17 = sshll.u32 %s3447_s10, 4  ;;  %s1914_s17 = int_to_ptr.hbm [resolvable:$true] %s1913_s17 }
  0x34   :  { %v2929_v55 = vld [vmem:[#allocation11 + $0x3ec] sm:$0xf0]  ;;  %v2258_v56 = vld [vmem:[#allocation11 + $0x1e0] sm:$0xf]  ;;  %v2115_v2 = vor.u32 %v2829_v51, %v2114_v50  ;;  %s3292_s19 = smov [#allocation16]   ;;  %s1924_s24 = sshll.u32 %s3448_s11, 4  ;;  %s1925_s24 = int_to_ptr.hbm [resolvable:$true] %s1924_s24 }
  0x35   :  { %v2865_v57 = vld [vmem:[#allocation11 + $0x1ec] sm:$0xf0]  ;;  %v2386_v58 = vld [vmem:[#allocation11 + $0x2e0] sm:$0xf]  ;;  %v2515_v3 = vor.u32 %v2929_v55, %v2514_v54  ;;  %s1911_s20 = sshll.u32 %s3292_s19, 4  ;;  %s1912_s20 = int_to_ptr.vmem [resolvable:$true] %s1911_s20 }
  0x36   :  { %v2897_v59 = vld [vmem:[#allocation11 + $0x2ec] sm:$0xf0]  ;;  %325 = vmatpush.bf16.msra.mxu1 %v1951_v43  ;;  %v2259_v61 = vor.u32 %v2865_v57, %v2258_v56  ;;  %338 = vmatpush.bf16.msra.mxu2 %v1955_v47  ;;  %v2242_v0 = vld [vmem:[#allocation11 + $0x1c0] sm:$0xf] }
  0x37   :  { %v2387_v62 = vor.u32 %v2897_v59, %v2386_v58  ;;  %363 = vmatpush.bf16.msrb.mxu0 %v1979_v48  ;;  %v2861_v1 = vld [vmem:[#allocation11 + $0x1cc] sm:$0xf0]  ;;  %351 = vmatpush.bf16.msra.mxu3 %v1959_v52  ;;  %v2098_v4 = vld [vmem:[#allocation11 + $0xa0] sm:$0xf] }
  0x38   :  { %v2370_v5 = vld [vmem:[#allocation11 + $0x2c0] sm:$0xf]  ;;  %v2893_v6 = vld [vmem:[#allocation11 + $0x2cc] sm:$0xf0]  ;;  %v2243_v10 = vor.u32 %v2861_v1, %v2242_v0 }
  0x39   :  { %2012 = vmatmul.msk.bf16.vlgmr.msra.gmra.mxu1 %vm314_vm1, %v207_v60  ;;  %v2825_v7 = vld [vmem:[#allocation11 + $0xac] sm:$0xf0]  ;;  %v2498_v8 = vld [vmem:[#allocation11 + $0x3c0] sm:$0xf]  ;;  %2013 = vmatmul.msk.bf16.vlgmr.msra.gmra.mxu2 %vm314_vm1, %v207_v60  ;;  %v2371_v11 = vor.u32 %v2893_v6, %v2370_v5  ;;  %v2831_v6 = vld [vmem:[#allocation11 + $0xe4] sm:$0xf] }
  0x3a   :  { %1156 = vmatpush.bf16.msrb.mxu1 %v2131_v53  ;;  %1169 = vmatpush.bf16.msrb.mxu2 %v2259_v61  ;;  %v2925_v9 = vld [vmem:[#allocation11 + $0x3cc] sm:$0xf0]  ;;  %v2226_v12 = vld [vmem:[#allocation11 + $0x1a0] sm:$0xf]  ;;  %v2099_v16 = vor.u32 %v2825_v7, %v2098_v4  ;;  %v2132_v7 = vld [vmem:[#allocation11 + $0xf0] sm:$0xf0] }
  0x3b   :  { %1182 = vmatpush.bf16.msrb.mxu3 %v2387_v62  ;;  %v2857_v13 = vld [vmem:[#allocation11 + $0x1ac] sm:$0xf0]  ;;  %364 = vmatpush.bf16.msrb.mxu0 %v1963_v63  ;;  %v2354_v14 = vld [vmem:[#allocation11 + $0x2a0] sm:$0xf]  ;;  %v2499_v17 = vor.u32 %v2925_v9, %v2498_v8 }
  0x3c   :  { %2014 = vmatmul.msk.bf16.vlgmr.msra.gmra.mxu3 %vm314_vm1, %v207_v60  ;;  %v2889_v15 = vld [vmem:[#allocation11 + $0x2ac] sm:$0xf0]  ;;  %v2082_v18 = vld [vmem:[#allocation11 + $0x80] sm:$0xf]  ;;  %v2227_v22 = vor.u32 %v2857_v13, %v2226_v12 }
  0x3d   :  { %v2821_v19 = vld [vmem:[#allocation11 + $0x8c] sm:$0xf0]  ;;  %v2482_v20 = vld [vmem:[#allocation11 + $0x3a0] sm:$0xf]  ;;  %v2355_v23 = vor.u32 %v2889_v15, %v2354_v14  ;;  %v2863_v14 = vld [vmem:[#allocation11 + $0x1e4] sm:$0xf] }
  0x3e   :  { %1157 = vmatpush.bf16.msrb.mxu1 %v2115_v2  ;;  %1170 = vmatpush.bf16.msrb.mxu2 %v2243_v10  ;;  %v2921_v21 = vld [vmem:[#allocation11 + $0x3ac] sm:$0xf0]  ;;  %v2210_v24 = vld [vmem:[#allocation11 + $0x180] sm:$0xf]  ;;  %v2083_v28 = vor.u32 %v2821_v19, %v2082_v18  ;;  %v2260_v15 = vld [vmem:[#allocation11 + $0x1f0] sm:$0xf0] }
  0x3f   :  { %1195 = vmatpush.bf16.msra.mxu0 %v2515_v3  ;;  %1183 = vmatpush.bf16.msrb.mxu3 %v2371_v11  ;;  %v2853_v25 = vld [vmem:[#allocation11 + $0x18c] sm:$0xf0]  ;;  %v2338_v26 = vld [vmem:[#allocation11 + $0x280] sm:$0xf]  ;;  %v2483_v29 = vor.u32 %v2921_v21, %v2482_v20  ;;  %v2895_v18 = vld [vmem:[#allocation11 + $0x2e4] sm:$0xf]  ;;  %v2135_v20 = vor.u32 %v2831_v6, %v2132_v7 }
  0x40   :  { %2015 = vmatmul.msk.bf16.vlgmr.msrb.gmra.mxu0 %vm314_vm1, %v207_v60  ;;  %v2885_v27 = vld [vmem:[#allocation11 + $0x28c] sm:$0xf0]  ;;  %v2066_v30 = vld [vmem:[#allocation11 + $0x60] sm:$0xf]  ;;  %v2211_v34 = vor.u32 %v2853_v25, %v2210_v24  ;;  %v2388_v19 = vld [vmem:[#allocation11 + $0x2f0] sm:$0xf0] }
  0x41   :  { %v2817_v31 = vld [vmem:[#allocation11 + $0x6c] sm:$0xf0]  ;;  %v2466_v32 = vld [vmem:[#allocation11 + $0x380] sm:$0xf]  ;;  %v2339_v35 = vor.u32 %v2885_v27, %v2338_v26  ;;  %v2116_v25 = vld [vmem:[#allocation11 + $0xd0] sm:$0xf0] }
  0x42   :  { %1158 = vmatpush.bf16.msrb.mxu1 %v2099_v16  ;;  %1171 = vmatpush.bf16.msrb.mxu2 %v2227_v22  ;;  %v2917_v33 = vld [vmem:[#allocation11 + $0x38c] sm:$0xf0]  ;;  %v2194_v36 = vld [vmem:[#allocation11 + $0x160] sm:$0xf]  ;;  %v2067_v40 = vor.u32 %v2817_v31, %v2066_v30  ;;  %v2927_v26 = vld [vmem:[#allocation11 + $0x3e4] sm:$0xf]  ;;  %v2391_v30 = vor.u32 %v2895_v18, %v2388_v19 }
  0x43   :  { %1196 = vmatpush.bf16.msra.mxu0 %v2499_v17  ;;  %1184 = vmatpush.bf16.msrb.mxu3 %v2355_v23  ;;  %v2849_v37 = vld [vmem:[#allocation11 + $0x16c] sm:$0xf0]  ;;  %v2322_v38 = vld [vmem:[#allocation11 + $0x260] sm:$0xf]  ;;  %v2467_v41 = vor.u32 %v2917_v33, %v2466_v32  ;;  %v2827_v23 = vld [vmem:[#allocation11 + $0xc4] sm:$0xf] }
  0x44   :  { %v2881_v39 = vld [vmem:[#allocation11 + $0x26c] sm:$0xf0]  ;;  %v2050_v42 = vld [vmem:[#allocation11 + $0x40] sm:$0xf]  ;;  %v2195_v46 = vor.u32 %v2849_v37, %v2194_v36  ;;  %v2516_v27 = vld [vmem:[#allocation11 + $0x3f0] sm:$0xf0]  ;;  %v2119_v32 = vor.u32 %v2827_v23, %v2116_v25 }
  0x45   :  { %v2813_v43 = vld [vmem:[#allocation11 + $0x4c] sm:$0xf0]  ;;  %v2450_v44 = vld [vmem:[#allocation11 + $0x360] sm:$0xf]  ;;  %v2323_v47 = vor.u32 %v2881_v39, %v2322_v38  ;;  %v2519_v33 = vor.u32 %v2927_v26, %v2516_v27  ;;  %v2923_v36 = vld [vmem:[#allocation11 + $0x3c4] sm:$0xf] }
  0x46   :  { %1159 = vmatpush.bf16.msrb.mxu1 %v2083_v28  ;;  %1172 = vmatpush.bf16.msrb.mxu2 %v2211_v34  ;;  %v2913_v45 = vld [vmem:[#allocation11 + $0x36c] sm:$0xf0]  ;;  %v2178_v48 = vld [vmem:[#allocation11 + $0x140] sm:$0xf]  ;;  %v2051_v52 = vor.u32 %v2813_v43, %v2050_v42  ;;  %v2823_v34 = vld [vmem:[#allocation11 + $0xa4] sm:$0xf] }
  0x47   :  { %1197 = vmatpush.bf16.msra.mxu0 %v2483_v29  ;;  %1185 = vmatpush.bf16.msrb.mxu3 %v2339_v35  ;;  %v2845_v49 = vld [vmem:[#allocation11 + $0x14c] sm:$0xf0]  ;;  %v2306_v50 = vld [vmem:[#allocation11 + $0x240] sm:$0xf]  ;;  %v2451_v53 = vor.u32 %v2913_v45, %v2450_v44  ;;  %v2263_v29 = vor.u32 %v2863_v14, %v2260_v15  ;;  %v2100_v35 = vld [vmem:[#allocation11 + $0xb0] sm:$0xf0] }
  0x48   :  { %v2877_v51 = vld [vmem:[#allocation11 + $0x24c] sm:$0xf0]  ;;  %v2034_v54 = vld [vmem:[#allocation11 + $0x20] sm:$0xf]  ;;  %v2179_v58 = vor.u32 %v2845_v49, %v2178_v48  ;;  %v2500_v37 = vld [vmem:[#allocation11 + $0x3d0] sm:$0xf0]  ;;  %v2103_v38 = vor.u32 %v2823_v34, %v2100_v35 }
  0x49   :  { %v2809_v55 = vld [vmem:[#allocation11 + $0x2c] sm:$0xf0]  ;;  %v2434_v56 = vld [vmem:[#allocation11 + $0x340] sm:$0xf]  ;;  %v2307_v59 = vor.u32 %v2877_v51, %v2306_v50  ;;  %v2503_v39 = vor.u32 %v2923_v36, %v2500_v37  ;;  %v2891_v42 = vld [vmem:[#allocation11 + $0x2c4] sm:$0xf] }
  0x4a   :  { %1160 = vmatpush.bf16.msrb.mxu1 %v2067_v40  ;;  %1173 = vmatpush.bf16.msrb.mxu2 %v2195_v46  ;;  %v2909_v57 = vld [vmem:[#allocation11 + $0x34c] sm:$0xf0]  ;;  %v2162_v60 = vld [vmem:[#allocation11 + $0x120] sm:$0xf]  ;;  %v2035_v1 = vor.u32 %v2809_v55, %v2034_v54  ;;  %v2859_v40 = vld [vmem:[#allocation11 + $0x1c4] sm:$0xf] }
  0x4b   :  { %1198 = vmatpush.bf16.msra.mxu0 %v2467_v41  ;;  %1186 = vmatpush.bf16.msrb.mxu3 %v2323_v47  ;;  %v2841_v61 = vld [vmem:[#allocation11 + $0x12c] sm:$0xf0]  ;;  %v2018_v62 = vld [vmem:[#allocation11] sm:$0xf]  ;;  %v2435_v2 = vor.u32 %v2909_v57, %v2434_v56  ;;  %v2244_v41 = vld [vmem:[#allocation11 + $0x1d0] sm:$0xf0] }
  0x4c   :  { %v2290_v63 = vld [vmem:[#allocation11 + $0x220] sm:$0xf]  ;;  %v2873_v0 = vld [vmem:[#allocation11 + $0x22c] sm:$0xf0]  ;;  %v2163_v8 = vor.u32 %v2841_v61, %v2162_v60  ;;  %v2247_v43 = vor.u32 %v2859_v40, %v2244_v41  ;;  %v2372_v44 = vld [vmem:[#allocation11 + $0x2d0] sm:$0xf0] }
  0x4d   :  { %v2805_v3 = vld [vmem:[#allocation11 + $0xc] sm:$0xf0]  ;;  %v2418_v4 = vld [vmem:[#allocation11 + $0x320] sm:$0xf]  ;;  %v2291_v9 = vor.u32 %v2873_v0, %v2290_v63  ;;  %v2919_v45 = vld [vmem:[#allocation11 + $0x3a4] sm:$0xf]  ;;  %v2375_v47 = vor.u32 %v2891_v42, %v2372_v44 }
  0x4e   :  { %1161 = vmatpush.bf16.msrb.mxu1 %v2051_v52  ;;  %1174 = vmatpush.bf16.msrb.mxu2 %v2179_v58  ;;  %v2905_v5 = vld [vmem:[#allocation11 + $0x32c] sm:$0xf0]  ;;  %v2146_v10 = vld [vmem:[#allocation11 + $0x100] sm:$0xf]  ;;  %v2019_v16 = vor.u32 %v2805_v3, %v2018_v62  ;;  %v2484_v46 = vld [vmem:[#allocation11 + $0x3b0] sm:$0xf0] }
  0x4f   :  { %1199 = vmatpush.bf16.msra.mxu0 %v2451_v53  ;;  %1187 = vmatpush.bf16.msrb.mxu3 %v2307_v59  ;;  %v2837_v11 = vld [vmem:[#allocation11 + $0x10c] sm:$0xf0]  ;;  %v2274_v12 = vld [vmem:[#allocation11 + $0x200] sm:$0xf]  ;;  %v2419_v17 = vor.u32 %v2905_v5, %v2418_v4  ;;  %v2819_v48 = vld [vmem:[#allocation11 + $0x84] sm:$0xf]  ;;  %v2487_v50 = vor.u32 %v2919_v45, %v2484_v46 }
  0x50   :  { %v2869_v13 = vld [vmem:[#allocation11 + $0x20c] sm:$0xf0]  ;;  %v2402_v21 = vld [vmem:[#allocation11 + $0x300] sm:$0xf]  ;;  %v2147_v24 = vor.u32 %v2837_v11, %v2146_v10  ;;  %v2084_v49 = vld [vmem:[#allocation11 + $0x90] sm:$0xf0] }
  0x51   :  { %v2901_v22 = vld [vmem:[#allocation11 + $0x30c] sm:$0xf0]  ;;  %v2275_v28 = vor.u32 %v2869_v13, %v2274_v12  ;;  %v2087_v51 = vor.u32 %v2819_v48, %v2084_v49  ;;  %v2855_v52 = vld [vmem:[#allocation11 + $0x1a4] sm:$0xf]  ;;  %v2228_v53 = vld [vmem:[#allocation11 + $0x1b0] sm:$0xf0] }
  0x52   :  { %1162 = vmatpush.bf16.msrb.mxu1 %v2035_v1  ;;  %1175 = vmatpush.bf16.msrb.mxu2 %v2163_v8  ;;  %v2403_v31 = vor.u32 %v2901_v22, %v2402_v21  ;;  %v2887_v54 = vld [vmem:[#allocation11 + $0x2a4] sm:$0xf]  ;;  %v2231_v55 = vor.u32 %v2855_v52, %v2228_v53  ;;  %v2356_v56 = vld [vmem:[#allocation11 + $0x2b0] sm:$0xf0] }
  0x53   :  { %1200 = vmatpush.bf16.msra.mxu0 %v2435_v2  ;;  %1188 = vmatpush.bf16.msrb.mxu3 %v2291_v9  ;;  %v2915_v57 = vld [vmem:[#allocation11 + $0x384] sm:$0xf]  ;;  %v2468_v58 = vld [vmem:[#allocation11 + $0x390] sm:$0xf0]  ;;  %v2359_v59 = vor.u32 %v2887_v54, %v2356_v56 }
  0x54   :  { %v2815_v60 = vld [vmem:[#allocation11 + $0x64] sm:$0xf]  ;;  %v2068_v61 = vld [vmem:[#allocation11 + $0x70] sm:$0xf0]  ;;  %v2471_v62 = vor.u32 %v2915_v57, %v2468_v58  ;;  %v224_v57 = vld [vmem:[%s3442_s5] sm:$0xf] }
  0x55   :  { %v2071_v63 = vor.u32 %v2815_v60, %v2068_v61  ;;  %v2851_v0 = vld [vmem:[#allocation11 + $0x184] sm:$0xf]  ;;  %v2212_v1 = vld [vmem:[#allocation11 + $0x190] sm:$0xf0] }
  0x56   :  { %1163 = vmatpush.bf16.msrb.mxu1 %v2019_v16  ;;  %1176 = vmatpush.bf16.msrb.mxu2 %v2147_v24  ;;  %v2883_v2 = vld [vmem:[#allocation11 + $0x284] sm:$0xf]  ;;  %v2215_v3 = vor.u32 %v2851_v0, %v2212_v1  ;;  %v2340_v4 = vld [vmem:[#allocation11 + $0x290] sm:$0xf0]  ;;  %v229_v1 = vperm.slane %v224_v57, 3 }
  0x57   :  { %1201 = vmatpush.bf16.msra.mxu0 %v2419_v17  ;;  %1189 = vmatpush.bf16.msrb.mxu3 %v2275_v28  ;;  %v2911_v5 = vld [vmem:[#allocation11 + $0x364] sm:$0xf]  ;;  %v2452_v6 = vld [vmem:[#allocation11 + $0x370] sm:$0xf0]  ;;  %v2343_v7 = vor.u32 %v2883_v2, %v2340_v4 }
  0x58   :  { %v2811_v8 = vld [vmem:[#allocation11 + $0x44] sm:$0xf]  ;;  %v2052_v9 = vld [vmem:[#allocation11 + $0x50] sm:$0xf0]  ;;  %v2455_v10 = vor.u32 %v2911_v5, %v2452_v6  ;;  %v227_v5 = vperm.slane %v224_v57, 1 }
  0x59   :  { %v2055_v11 = vor.u32 %v2811_v8, %v2052_v9  ;;  %v2847_v12 = vld [vmem:[#allocation11 + $0x164] sm:$0xf]  ;;  %v2196_v13 = vld [vmem:[#allocation11 + $0x170] sm:$0xf0]  ;;  %v228_v9 = vperm.slane %v224_v57, 2 }
  0x5a   :  { %1208 = vmatpush.bf16.msra.mxu1 %v2135_v20  ;;  %1221 = vmatpush.bf16.msra.mxu2 %v2263_v29  ;;  %v2879_v14 = vld [vmem:[#allocation11 + $0x264] sm:$0xf]  ;;  %v2199_v15 = vor.u32 %v2847_v12, %v2196_v13  ;;  %v2324_v16 = vld [vmem:[#allocation11 + $0x270] sm:$0xf0] }
  0x5b   :  { %1234 = vmatpush.bf16.msra.mxu3 %v2391_v30  ;;  %1202 = vmatpush.bf16.msra.mxu0 %v2403_v31  ;;  %v2907_v17 = vld [vmem:[#allocation11 + $0x344] sm:$0xf]  ;;  %v2327_v18 = vor.u32 %v2879_v14, %v2324_v16  ;;  %v2036_v20 = vld [vmem:[#allocation11 + $0x30] sm:$0xf0]  ;;  %v2522_v14 = vld [vmem:[#allocation11 + $0x3e8] sm:$0xf]  ;;  %v202_v16 = vlaneseq }
  0x5c   :  { %v2807_v19 = vld [vmem:[#allocation11 + $0x24] sm:$0xf]  ;;  %v2436_v22 = vld [vmem:[#allocation11 + $0x350] sm:$0xf0] }
  0x5d   :  { %v2039_v21 = vor.u32 %v2807_v19, %v2036_v20  ;;  %v2439_v23 = vor.u32 %v2907_v17, %v2436_v22  ;;  %v2843_v24 = vld [vmem:[#allocation11 + $0x144] sm:$0xf]  ;;  %v2180_v25 = vld [vmem:[#allocation11 + $0x150] sm:$0xf0]  ;;  %v2266_v19 = vld [vmem:[#allocation11 + $0x1e8] sm:$0xf] }
  0x5e   :  { %1209 = vmatpush.bf16.msra.mxu1 %v2119_v32  ;;  %1222 = vmatpush.bf16.msra.mxu2 %v2247_v43  ;;  %v2875_v26 = vld [vmem:[#allocation11 + $0x244] sm:$0xf]  ;;  %v2183_v27 = vor.u32 %v2843_v24, %v2180_v25  ;;  %v2308_v28 = vld [vmem:[#allocation11 + $0x250] sm:$0xf0]  ;;  %v2866_v20 = vld [vmem:[#allocation11 + $0x1f4] sm:$0xf0] }
  0x5f   :  { %1247 = vmatpush.bf16.msrb.mxu0 %v2519_v33  ;;  %1235 = vmatpush.bf16.msra.mxu3 %v2375_v47  ;;  %v2903_v29 = vld [vmem:[#allocation11 + $0x324] sm:$0xf]  ;;  %v2311_v30 = vor.u32 %v2875_v26, %v2308_v28  ;;  %v2020_v32 = vld [vmem:[#allocation11 + $0x10] sm:$0xf0]  ;;  %v2394_v26 = vld [vmem:[#allocation11 + $0x2e8] sm:$0xf] }
  0x60   :  { %v2803_v31 = vld [vmem:[#allocation11 + $0x4] sm:$0xf]  ;;  %v2420_v33 = vld [vmem:[#allocation11 + $0x330] sm:$0xf0] }
  0x61   :  { %v2023_v34 = vor.u32 %v2803_v31, %v2020_v32  ;;  %v2423_v35 = vor.u32 %v2903_v29, %v2420_v33  ;;  %v2839_v36 = vld [vmem:[#allocation11 + $0x124] sm:$0xf]  ;;  %v2164_v37 = vld [vmem:[#allocation11 + $0x130] sm:$0xf0]  ;;  %v2826_v31 = vld [vmem:[#allocation11 + $0xb4] sm:$0xf0] }
  0x62   :  { %1210 = vmatpush.bf16.msra.mxu1 %v2103_v38  ;;  %1223 = vmatpush.bf16.msra.mxu2 %v2231_v55  ;;  %v2167_v38 = vor.u32 %v2839_v36, %v2164_v37  ;;  %v2292_v40 = vld [vmem:[#allocation11 + $0x230] sm:$0xf0]  ;;  %v2899_v41 = vld [vmem:[#allocation11 + $0x304] sm:$0xf]  ;;  %v2506_v32 = vld [vmem:[#allocation11 + $0x3c8] sm:$0xf] }
  0x63   :  { %1248 = vmatpush.bf16.msrb.mxu0 %v2503_v39  ;;  %1236 = vmatpush.bf16.msra.mxu3 %v2359_v59  ;;  %v2871_v39 = vld [vmem:[#allocation11 + $0x224] sm:$0xf]  ;;  %v2404_v43 = vld [vmem:[#allocation11 + $0x310] sm:$0xf0]  ;;  %v226_v59 = vperm.slane %v224_v57, 0 }
  0x64   :  { %v2295_v42 = vor.u32 %v2871_v39, %v2292_v40  ;;  %v2407_v44 = vor.u32 %v2899_v41, %v2404_v43  ;;  %v2835_v45 = vld [vmem:[#allocation11 + $0x104] sm:$0xf]  ;;  %v2148_v46 = vld [vmem:[#allocation11 + $0x110] sm:$0xf0]  ;;  %v2926_v36 = vld [vmem:[#allocation11 + $0x3d4] sm:$0xf0] }
  0x65   :  { %v2867_v47 = vld [vmem:[#allocation11 + $0x204] sm:$0xf]  ;;  %v2151_v48 = vor.u32 %v2835_v45, %v2148_v46  ;;  %v2276_v49 = vld [vmem:[#allocation11 + $0x210] sm:$0xf0]  ;;  %v2250_v37 = vld [vmem:[#allocation11 + $0x1c8] sm:$0xf] }
  0x66   :  { %1211 = vmatpush.bf16.msra.mxu1 %v2087_v51  ;;  %1224 = vmatpush.bf16.msra.mxu2 %v2215_v3  ;;  %v3011_v51 = vld [vmem:[#allocation7] ss:$0 sm:$0xff] }
  0x67   :  { %1249 = vmatpush.bf16.msrb.mxu0 %v2487_v50  ;;  %1237 = vmatpush.bf16.msra.mxu3 %v2343_v7  ;;  %v2279_v50 = vor.u32 %v2867_v47, %v2276_v49  ;;  %v2862_v43 = vld [vmem:[#allocation11 + $0x1d4] sm:$0xf0] }
  0x68   :  { %v2894_v49 = vld [vmem:[#allocation11 + $0x2d4] sm:$0xf0] }
  0x69   :  { %v2846_v40 = vld [vmem:[#allocation11 + $0x154] sm:$0xf0] }
  0x6a   :  { %1212 = vmatpush.bf16.msra.mxu1 %v2071_v63  ;;  %1225 = vmatpush.bf16.msra.mxu2 %v2199_v15  ;;  %v2834_v63 = vld [vmem:[#allocation11 + $0xf4] sm:$0xf0] }
  0x6b   :  { %1250 = vmatpush.bf16.msrb.mxu0 %v2471_v62  ;;  %1238 = vmatpush.bf16.msra.mxu3 %v2327_v18  ;;  %v2138_v62 = vld [vmem:[#allocation11 + $0xe8] sm:$0xf]  ;;  %v2930_v15 = vld [vmem:[#allocation11 + $0x3f4] sm:$0xf0] }
  0x6c   :  { %v2139_v6 = vor.u32 %v2834_v63, %v2138_v62  ;;  %v2523_v29 = vor.u32 %v2930_v15, %v2522_v14  ;;  %v2251_v62 = vor.u32 %v2862_v43, %v2250_v37  ;;  %v2314_v43 = vld [vmem:[#allocation11 + $0x248] sm:$0xf] }
  0x6e   :  { %1213 = vmatpush.bf16.msra.mxu1 %v2055_v11  ;;  %1226 = vmatpush.bf16.msra.mxu2 %v2183_v27  ;;  %v2830_v11 = vld [vmem:[#allocation11 + $0xd4] sm:$0xf0] }
  0x6f   :  { %1251 = vmatpush.bf16.msrb.mxu0 %v2455_v10  ;;  %1239 = vmatpush.bf16.msra.mxu3 %v2311_v30  ;;  %v2122_v10 = vld [vmem:[#allocation11 + $0xc8] sm:$0xf]  ;;  %v2898_v27 = vld [vmem:[#allocation11 + $0x2f4] sm:$0xf0] }
  0x70   :  { %v2123_v25 = vor.u32 %v2830_v11, %v2122_v10  ;;  %v2106_v30 = vld [vmem:[#allocation11 + $0xa8] sm:$0xf]  ;;  %v2395_v46 = vor.u32 %v2898_v27, %v2394_v26  ;;  %v2850_v27 = vld [vmem:[#allocation11 + $0x174] sm:$0xf0] }
  0x71   :  { %v2107_v47 = vor.u32 %v2826_v31, %v2106_v30  ;;  %v2474_v11 = vld [vmem:[#allocation11 + $0x388] sm:$0xf]  ;;  %v2882_v31 = vld [vmem:[#allocation11 + $0x274] sm:$0xf0] }
  0x72   :  { %1214 = vmatpush.bf16.msra.mxu1 %v2039_v21  ;;  %1227 = vmatpush.bf16.msra.mxu2 %v2167_v38  ;;  %v203_v38 = vand.u32 127, %v202_v16  ;;  %v2218_v16 = vld [vmem:[#allocation11 + $0x188] sm:$0xf] }
  0x73   :  { %1252 = vmatpush.bf16.msrb.mxu0 %v2439_v23  ;;  %1240 = vmatpush.bf16.msra.mxu3 %v2295_v42  ;;  %v2267_v42 = vor.u32 %v2866_v20, %v2266_v19  ;;  %v2346_v19 = vld [vmem:[#allocation11 + $0x288] sm:$0xf]  ;;  %v2886_v20 = vld [vmem:[#allocation11 + $0x294] sm:$0xf0] }
  0x74   :  { %vm204_vm3 = vcmp.lt.s32.totalorder %v203_v38, 64  ;;  %v2202_v26 = vld [vmem:[#allocation11 + $0x168] sm:$0xf] }
  0x75   :  { %v2330_v30 = vld [vmem:[#allocation11 + $0x268] sm:$0xf]  ;;  %v2203_v37 = vor.u32 %v2850_v27, %v2202_v26  ;;  %v2860_v26 = vld [vmem:[#allocation11 + $0x1cc] sm:$0xf]  ;;  %v2252_v27 = vld [vmem:[#allocation11 + $0x1d8] sm:$0xf0] }
  0x76   :  { %1215 = vmatpush.bf16.msra.mxu1 %v2023_v34  ;;  %1228 = vmatpush.bf16.msra.mxu2 %v2151_v48  ;;  %v2378_v48 = vld [vmem:[#allocation11 + $0x2c8] sm:$0xf]  ;;  %v2331_v38 = vor.u32 %v2882_v31, %v2330_v30  ;;  %v2892_v30 = vld [vmem:[#allocation11 + $0x2cc] sm:$0xf]  ;;  %v2380_v31 = vld [vmem:[#allocation11 + $0x2d8] sm:$0xf0] }
  0x77   :  { %1253 = vmatpush.bf16.msrb.mxu0 %v2423_v35  ;;  %1241 = vmatpush.bf16.msra.mxu3 %v2279_v50 }
  0x7b   :  { %1254 = vmatpush.bf16.msrb.mxu0 %v2407_v44 }
  0xa8   :  { %v183_v52 = vpop.f32.mrf.mxu0 }
  0xa9   :  { %v3383_v53 = vadd.f32 %v3011_v51, %v183_v52  ;;  %v2507_v52 = vor.u32 %v2926_v36, %v2506_v32  ;;  %v2442_v32 = vld [vmem:[#allocation11 + $0x348] sm:$0xf]  ;;  %v2910_v36 = vld [vmem:[#allocation11 + $0x354] sm:$0xf0] }
  0xab   :  { %v188_v54 = vand.u32 2147483647, %v3383_v53  ;;  %v187_v50 = vmax.f32 %v3383_v53, 0.0 }
  0xad   :  { %v189_v55 = vsub.f32 0.0, %v188_v54 }
  0xaf   :  { %v190_v56 = vmul.f32 1.442695, %v189_v55  ;;  %v2090_v55 = vld [vmem:[#allocation11 + $0x88] sm:$0xf] }
  0xb0   :  { %v185_v58 = vpop.f32.mrf.mxu0 }
  0xb1   :  { %3012 = vpow2.f32 %v190_v56  ;;  %v2822_v56 = vld [vmem:[#allocation11 + $0x94] sm:$0xf0]  ;;  %v2490_v58 = vld [vmem:[#allocation11 + $0x3a8] sm:$0xf] }
  0xb6   :  { %v327_v60 = vpop.f32.mrf.mxu1 }
  0xb7   :  { %v328_v61 = vadd.f32 %v327_v60, %v226_v59  ;;  %v3013_v0 = vpop.eup %3012  ;;  %v2922_v59 = vld [vmem:[#allocation11 + $0x3b4] sm:$0xf0] }
  0xb8   :  { %v192_v2 = vadd.f32 1.0, %v3013_v0  ;;  %v195_v3 = vmul.f32 -0.5, %v3013_v0  ;;  %v198_v17 = vand.u32 2147483647, %v3013_v0 }
  0xb9   :  { %v370_v4 = vmax.f32 %v328_v61, 0.0 }
  0xba   :  { %3014 = vlog2.f32 %v192_v2  ;;  %v196_v12 = vadd.f32 1.0, %v195_v3  ;;  %vm3394_vm2 = vcmp.lt.f32.partialorder %v198_v17, 0.0004427343  ;;  %v2234_v2 = vld [vmem:[#allocation11 + $0x1a8] sm:$0xf] }
  0xbb   :  { %v3389_v7 = vpack.c.bf16 %v370_v4, %v370_v4  ;;  %v2858_v3 = vld [vmem:[#allocation11 + $0x1b4] sm:$0xf0]  ;;  %v2362_v4 = vld [vmem:[#allocation11 + $0x2a8] sm:$0xf] }
  0xbc   :  { %v340_v18 = vpop.f32.mrf.mxu2  ;;  %v197_v33 = vmul.f32 %v3013_v0, %v196_v12  ;;  %v2379_v0 = vor.u32 %v2894_v49, %v2378_v48  ;;  %v2918_v12 = vld [vmem:[#allocation11 + $0x394] sm:$0xf0] }
  0xbd   :  { %v366_v8 = vpop.f32.mrf.mxu0  ;;  %1164 = vmatmul.bf16.vlgmr.msrb.gmra.mxu1 %v3389_v7  ;;  %v341_v22 = vadd.f32 %v340_v18, %v227_v5  ;;  %v2491_v5 = vor.u32 %v2922_v59, %v2490_v58  ;;  %v2854_v17 = vld [vmem:[#allocation11 + $0x194] sm:$0xf0]  ;;  %v2475_v18 = vor.u32 %v2918_v12, %v2474_v11 }
  0xbe   :  { %v367_v13 = vadd.f32 %v366_v8, %v229_v1  ;;  %1260 = vmatpush.bf16.msrb.mxu1 %v2139_v6  ;;  %v329_v24 = vpop.f32.mrf.mxu1  ;;  %v2091_v1 = vor.u32 %v2822_v56, %v2090_v55  ;;  %v2890_v6 = vld [vmem:[#allocation11 + $0x2b4] sm:$0xf0]  ;;  %v2074_v8 = vld [vmem:[#allocation11 + $0x68] sm:$0xf] }
  0xbf   :  { %v353_v23 = vpop.f32.mrf.mxu3  ;;  %v371_v35 = vmax.f32 %v341_v22, 0.0  ;;  %v2363_v14 = vor.u32 %v2890_v6, %v2362_v4  ;;  %v2058_v22 = vld [vmem:[#allocation11 + $0x48] sm:$0xf]  ;;  %v2914_v24 = vld [vmem:[#allocation11 + $0x374] sm:$0xf0] }
  0xc0   :  { %v373_v21 = vmax.f32 %v367_v13, 0.0  ;;  %v354_v28 = vadd.f32 %v353_v23, %v228_v9  ;;  %v3015_v39 = vpop.eup %3014  ;;  %v2818_v9 = vld [vmem:[#allocation11 + $0x74] sm:$0xf0]  ;;  %v2235_v13 = vor.u32 %v2858_v3, %v2234_v2  ;;  %v2170_v56 = vld [vmem:[#allocation11 + $0x128] sm:$0xf] }
  0xc1   :  { %v194_v44 = vmul.f32 0.6931472, %v3015_v39  ;;  %v3398_v45 = vpack.c.bf16 %v371_v35, %v371_v35  ;;  %v2075_v15 = vor.u32 %v2818_v9, %v2074_v8  ;;  %v2814_v23 = vld [vmem:[#allocation11 + $0x54] sm:$0xf0]  ;;  %v2186_v39 = vld [vmem:[#allocation11 + $0x148] sm:$0xf] }
  0xc2   :  { %v3392_v34 = vpack.c.bf16 %v373_v21, %v373_v21  ;;  %v372_v41 = vmax.f32 %v354_v28, 0.0  ;;  %1261 = vmatpush.bf16.msrb.mxu1 %v2123_v25  ;;  %v2458_v21 = vld [vmem:[#allocation11 + $0x368] sm:$0xf]  ;;  %v2347_v25 = vor.u32 %v2886_v20, %v2346_v19  ;;  %v2059_v28 = vor.u32 %v2814_v23, %v2058_v22  ;;  %v2810_v35 = vld [vmem:[#allocation11 + $0x34] sm:$0xf0] }
  0xc3   :  { %v200_v57 = vsel %vm3394_vm2, %v197_v33, %v194_v44  ;;  %1177 = vmatmul.bf16.vlgmr.msrb.gmra.mxu2 %v3398_v45  ;;  %v2042_v33 = vld [vmem:[#allocation11 + $0x28] sm:$0xf]  ;;  %v2878_v44 = vld [vmem:[#allocation11 + $0x254] sm:$0xf0]  ;;  %v2124_v3 = vld [vmem:[#allocation11 + $0xd8] sm:$0xf0] }
  0xc4   :  { %1203 = vmatmul.bf16.vlgmr.msra.gmra.mxu0 %v3392_v34  ;;  %v3402_v51 = vpack.c.bf16 %v372_v41, %v372_v41  ;;  %v201_v60 = vadd.f32 %v200_v57, %v187_v50  ;;  %1273 = vmatpush.bf16.msrb.mxu2 %v2267_v42  ;;  %v342_v61 = vpop.f32.mrf.mxu2  ;;  %v2043_v41 = vor.u32 %v2810_v35, %v2042_v33  ;;  %v2806_v48 = vld [vmem:[#allocation11 + $0x14] sm:$0xf0]  ;;  %v2928_v4 = vld [vmem:[#allocation11 + $0x3ec] sm:$0xf]  ;;  %v2154_v8 = vld [vmem:[#allocation11 + $0x108] sm:$0xf] }
  0xc5   :  { %1299 = vmatpush.bf16.msra.mxu0 %v2523_v29  ;;  %v368_v54 = vpop.f32.mrf.mxu0  ;;  %v2459_v29 = vor.u32 %v2914_v24, %v2458_v21  ;;  %v2443_v42 = vor.u32 %v2910_v36, %v2442_v32  ;;  %v2906_v49 = vld [vmem:[#allocation11 + $0x334] sm:$0xf0]  ;;  %v2187_v50 = vor.u32 %v2846_v40, %v2186_v39  ;;  %v2315_v55 = vor.u32 %v2878_v44, %v2314_v43  ;;  %v2824_v19 = vld [vmem:[#allocation11 + $0xac] sm:$0xf]  ;;  %v2108_v21 = vld [vmem:[#allocation11 + $0xb8] sm:$0xf0] }
  0xc6   :  { %1190 = vmatmul.bf16.vlgmr.msrb.gmra.mxu3 %v3402_v51  ;;  %1262 = vmatpush.bf16.msrb.mxu1 %v2107_v47  ;;  %v205_v10 = vsel %vm204_vm3, %v3383_v53, %v201_v60  ;;  %v2219_v53 = vor.u32 %v2854_v17, %v2218_v16  ;;  %v2026_v47 = vld [vmem:[#allocation11 + $0x8] sm:$0xf]  ;;  %v2140_v54 = vld [vmem:[#allocation11 + $0xf8] sm:$0xf0]  ;;  %v2842_v57 = vld [vmem:[#allocation11 + $0x134] sm:$0xf0] }
  0xc7   :  { %1286 = vmatpush.bf16.msrb.mxu3 %v2395_v46  ;;  %v355_v63 = vpop.f32.mrf.mxu3  ;;  %206 = vst [vmem:[#allocation16] sm:$0xff] %v205_v10  ;;  %v2426_v46 = vld [vmem:[#allocation11 + $0x328] sm:$0xf]  ;;  %v2027_v58 = vor.u32 %v2806_v48, %v2026_v47  ;;  %v2874_v61 = vld [vmem:[#allocation11 + $0x234] sm:$0xf0]  ;;  %v2171_v2 = vor.u32 %v2842_v57, %v2170_v56 }
  0xc8   :  { %1274 = vmatpush.bf16.msrb.mxu2 %v2251_v62  ;;  %v2427_v59 = vor.u32 %v2906_v49, %v2426_v46  ;;  %v2298_v60 = vld [vmem:[#allocation11 + $0x228] sm:$0xf]  ;;  %v2838_v9 = vld [vmem:[#allocation11 + $0x114] sm:$0xf0]  ;;  %v2896_v17 = vld [vmem:[#allocation11 + $0x2ec] sm:$0xf] }
  0xc9   :  { %1300 = vmatpush.bf16.msra.mxu0 %v2507_v52  ;;  %v2832_v52 = vld [vmem:[#allocation11 + $0xec] sm:$0xf]  ;;  %v2410_v63 = vld [vmem:[#allocation11 + $0x308] sm:$0xf]  ;;  %v2299_v6 = vor.u32 %v2874_v61, %v2298_v60  ;;  %v2870_v12 = vld [vmem:[#allocation11 + $0x214] sm:$0xf0]  ;;  %v2155_v20 = vor.u32 %v2838_v9, %v2154_v8 }
  0xca   :  { %1263 = vmatpush.bf16.msrb.mxu1 %v2091_v1  ;;  %v2143_v62 = vor.u32 %v2832_v52, %v2140_v54  ;;  %v2828_v1 = vld [vmem:[#allocation11 + $0xcc] sm:$0xf]  ;;  %v2282_v10 = vld [vmem:[#allocation11 + $0x208] sm:$0xf]  ;;  %v2508_v23 = vld [vmem:[#allocation11 + $0x3d8] sm:$0xf0] }
  0xcb   :  { %1287 = vmatpush.bf16.msrb.mxu3 %v2379_v0  ;;  %v2902_v0 = vld [vmem:[#allocation11 + $0x314] sm:$0xf0]  ;;  %v2924_v22 = vld [vmem:[#allocation11 + $0x3cc] sm:$0xf]  ;;  %v2283_v24 = vor.u32 %v2870_v12, %v2282_v10  ;;  %v2092_v33 = vld [vmem:[#allocation11 + $0x98] sm:$0xf0] }
  0xcc   :  { %1275 = vmatpush.bf16.msrb.mxu2 %v2235_v13  ;;  %v2411_v11 = vor.u32 %v2902_v0, %v2410_v63  ;;  %v2864_v13 = vld [vmem:[#allocation11 + $0x1ec] sm:$0xf]  ;;  %v2492_v36 = vld [vmem:[#allocation11 + $0x3b8] sm:$0xf0]  ;;  %1916 = dma.vmem_to_hbm [thread:$0]  %s1912_s20, 128, %s1914_s17, [#allocation4]  }
  0xcd   :  { %1301 = vmatpush.bf16.msra.mxu0 %v2491_v5  ;;  %1216 = vmatmul.bf16.vlgmr.msra.gmra.mxu1 %v3389_v7  ;;  %v2524_v5 = vld [vmem:[#allocation11 + $0x3f8] sm:$0xf0]  ;;  %v2820_v32 = vld [vmem:[#allocation11 + $0x8c] sm:$0xf] }
  0xce   :  { %1264 = vmatpush.bf16.msrb.mxu1 %v2075_v15  ;;  %v2127_v15 = vor.u32 %v2828_v1, %v2124_v3  ;;  %v2527_v16 = vor.u32 %v2928_v4, %v2524_v5  ;;  %v2920_v35 = vld [vmem:[#allocation11 + $0x3ac] sm:$0xf]  ;;  %v2236_v40 = vld [vmem:[#allocation11 + $0x1b8] sm:$0xf0] }
  0xcf   :  { %1288 = vmatpush.bf16.msrb.mxu3 %v2363_v14  ;;  %v2268_v14 = vld [vmem:[#allocation11 + $0x1f8] sm:$0xf0]  ;;  %v2856_v39 = vld [vmem:[#allocation11 + $0x1ac] sm:$0xf] }
  0xd0   :  { %1276 = vmatpush.bf16.msrb.mxu2 %v2219_v53  ;;  %v2271_v53 = vor.u32 %v2864_v13, %v2268_v14  ;;  %v2888_v43 = vld [vmem:[#allocation11 + $0x2ac] sm:$0xf]  ;;  %v2364_v44 = vld [vmem:[#allocation11 + $0x2b8] sm:$0xf0] }
  0xd1   :  { %1302 = vmatpush.bf16.msra.mxu0 %v2475_v18  ;;  %v2396_v18 = vld [vmem:[#allocation11 + $0x2f8] sm:$0xf0]  ;;  %v2916_v46 = vld [vmem:[#allocation11 + $0x38c] sm:$0xf]  ;;  %v2367_v52 = vor.u32 %v2888_v43, %v2364_v44 }
  0xd2   :  { %1265 = vmatpush.bf16.msrb.mxu1 %v2059_v28  ;;  %v2111_v28 = vor.u32 %v2824_v19, %v2108_v21  ;;  %v2816_v47 = vld [vmem:[#allocation11 + $0x6c] sm:$0xf]  ;;  %v2076_v48 = vld [vmem:[#allocation11 + $0x78] sm:$0xf0] }
  0xd3   :  { %1289 = vmatpush.bf16.msrb.mxu3 %v2347_v25  ;;  %1229 = vmatmul.bf16.vlgmr.msra.gmra.mxu2 %v3398_v45  ;;  %v2399_v25 = vor.u32 %v2896_v17, %v2396_v18  ;;  %v2476_v49 = vld [vmem:[#allocation11 + $0x398] sm:$0xf0]  ;;  %v2852_v54 = vld [vmem:[#allocation11 + $0x18c] sm:$0xf]  ;;  %v2079_v56 = vor.u32 %v2816_v47, %v2076_v48 }
  0xd4   :  { %1255 = vmatmul.bf16.vlgmr.msrb.gmra.mxu0 %v3392_v34  ;;  %1277 = vmatpush.bf16.msrb.mxu2 %v2203_v37  ;;  %v2255_v37 = vor.u32 %v2860_v26, %v2252_v27  ;;  %v2479_v57 = vor.u32 %v2916_v46, %v2476_v49  ;;  %v2912_v60 = vld [vmem:[#allocation11 + $0x36c] sm:$0xf]  ;;  %v2460_v63 = vld [vmem:[#allocation11 + $0x378] sm:$0xf0]  ;;  %v2650_v49 = vld [vmem:[#allocation14 + $0xf0] sm:$0xf] }
  0xd5   :  { %1303 = vmatpush.bf16.msra.mxu0 %v2459_v29  ;;  %v2511_v29 = vor.u32 %v2924_v22, %v2508_v23  ;;  %v2812_v61 = vld [vmem:[#allocation11 + $0x4c] sm:$0xf]  ;;  %v2204_v3 = vld [vmem:[#allocation11 + $0x178] sm:$0xf0]  ;;  %v2463_v5 = vor.u32 %v2912_v60, %v2460_v63 }
  0xd6   :  { %1242 = vmatmul.bf16.vlgmr.msra.gmra.mxu3 %v3402_v51  ;;  %1266 = vmatpush.bf16.msrb.mxu1 %v2043_v41  ;;  %v2095_v41 = vor.u32 %v2820_v32, %v2092_v33  ;;  %v2332_v8 = vld [vmem:[#allocation11 + $0x278] sm:$0xf0]  ;;  %v2908_v9 = vld [vmem:[#allocation11 + $0x34c] sm:$0xf] }
  0xd7   :  { %1290 = vmatpush.bf16.msrb.mxu3 %v2331_v38  ;;  %v2383_v38 = vor.u32 %v2892_v30, %v2380_v31  ;;  %v2808_v10 = vld [vmem:[#allocation11 + $0x2c] sm:$0xf]  ;;  %v2444_v12 = vld [vmem:[#allocation11 + $0x358] sm:$0xf0] }
  0xd8   :  { %1278 = vmatpush.bf16.msrb.mxu2 %v2187_v50  ;;  %v2239_v50 = vor.u32 %v2856_v39, %v2236_v40  ;;  %v2447_v18 = vor.u32 %v2908_v9, %v2444_v12  ;;  %v2876_v19 = vld [vmem:[#allocation11 + $0x24c] sm:$0xf]  ;;  %v2028_v23 = vld [vmem:[#allocation11 + $0x18] sm:$0xf0]  ;;  %v2578_v39 = vld [vmem:[#allocation14 + $0x60] sm:$0xf] }
  0xd9   :  { %1304 = vmatpush.bf16.msra.mxu0 %v2443_v42  ;;  %v2495_v42 = vor.u32 %v2920_v35, %v2492_v36  ;;  %v2904_v21 = vld [vmem:[#allocation11 + $0x32c] sm:$0xf]  ;;  %v2946_v26 = vld [vmem:[#allocation14 + $0x74] sm:$0xf0]  ;;  %v2626_v12 = vld [vmem:[#allocation14 + $0xc0] sm:$0xf] }
  0xda   :  { %1267 = vmatpush.bf16.msrb.mxu1 %v2027_v58  ;;  %v2884_v58 = vld [vmem:[#allocation11 + $0x28c] sm:$0xf]  ;;  %v2300_v33 = vld [vmem:[#allocation11 + $0x238] sm:$0xf0] }
  0xdb   :  { %1291 = vmatpush.bf16.msrb.mxu3 %v2315_v55  ;;  %v2220_v55 = vld [vmem:[#allocation11 + $0x198] sm:$0xf0]  ;;  %v2804_v22 = vld [vmem:[#allocation11 + $0xc] sm:$0xf] }
  0xdc   :  { %1279 = vmatpush.bf16.msrb.mxu2 %v2171_v2  ;;  %v2223_v0 = vor.u32 %v2852_v54, %v2220_v55  ;;  %v2848_v2 = vld [vmem:[#allocation11 + $0x16c] sm:$0xf]  ;;  %v2031_v30 = vor.u32 %v2804_v22, %v2028_v23  ;;  %v2412_v36 = vld [vmem:[#allocation11 + $0x318] sm:$0xf0]  ;;  %v2570_v54 = vld [vmem:[#allocation14 + $0x50] sm:$0xf] }
  0xdd   :  { %1305 = vmatpush.bf16.msra.mxu0 %v2427_v59  ;;  %1268 = vmatmul.bf16.vlgmr.msrb.gmra.mxu1 %v3389_v7  ;;  %v2348_v59 = vld [vmem:[#allocation11 + $0x298] sm:$0xf0]  ;;  %v2207_v13 = vor.u32 %v2848_v2, %v2204_v3  ;;  %v2872_v32 = vld [vmem:[#allocation11 + $0x22c] sm:$0xf]  ;;  %v2546_v3 = vld [vmem:[#allocation14 + $0x20] sm:$0xf] }
  0xde   :  { %1312 = vmatpush.bf16.msra.mxu1 %v2143_v62  ;;  %v2060_v62 = vld [vmem:[#allocation11 + $0x58] sm:$0xf0]  ;;  %v2351_v1 = vor.u32 %v2884_v58, %v2348_v59  ;;  %v2900_v35 = vld [vmem:[#allocation11 + $0x30c] sm:$0xf]  ;;  %v2642_v59 = vld [vmem:[#allocation14 + $0xe0] sm:$0xf] }
  0xdf   :  { %1292 = vmatpush.bf16.msrb.mxu3 %v2299_v6  ;;  %v2063_v4 = vor.u32 %v2812_v61, %v2060_v62  ;;  %v2880_v6 = vld [vmem:[#allocation11 + $0x26c] sm:$0xf]  ;;  %v2156_v43 = vld [vmem:[#allocation11 + $0x118] sm:$0xf0]  ;;  %v2415_v44 = vor.u32 %v2900_v35, %v2412_v36  ;;  %v2562_v61 = vld [vmem:[#allocation14 + $0x40] sm:$0xf] }
  0xe0   :  { %1280 = vmatpush.bf16.msrb.mxu2 %v2155_v20  ;;  %v2335_v14 = vor.u32 %v2880_v6, %v2332_v8  ;;  %v2316_v20 = vld [vmem:[#allocation11 + $0x258] sm:$0xf0]  ;;  %v2944_v40 = vld [vmem:[#allocation14 + $0x64] sm:$0xf0]  ;;  %v2538_v6 = vld [vmem:[#allocation14 + $0x10] sm:$0xf] }
  0xe1   :  { %1306 = vmatpush.bf16.msra.mxu0 %v2411_v11  ;;  %v2044_v11 = vld [vmem:[#allocation11 + $0x38] sm:$0xf0]  ;;  %v2319_v27 = vor.u32 %v2876_v19, %v2316_v20  ;;  %v2868_v46 = vld [vmem:[#allocation11 + $0x20c] sm:$0xf]  ;;  %v2579_v48 = vor.u32 %v2944_v40, %v2578_v39  ;;  %v2634_v8 = vld [vmem:[#allocation14 + $0xd0] sm:$0xf] }
  0xe2   :  { %1313 = vmatpush.bf16.msra.mxu1 %v2127_v15  ;;  %v2844_v15 = vld [vmem:[#allocation11 + $0x14c] sm:$0xf]  ;;  %v2047_v17 = vor.u32 %v2808_v10, %v2044_v11  ;;  %v2284_v47 = vld [vmem:[#allocation11 + $0x218] sm:$0xf0]  ;;  %v2530_v11 = vld [vmem:[#allocation14] sm:$0xf] }
  0xe3   :  { %1293 = vmatpush.bf16.msrb.mxu3 %v2283_v24  ;;  %1281 = vmatmul.bf16.vlgmr.msrb.gmra.mxu2 %v3398_v45  ;;  %v2428_v24 = vld [vmem:[#allocation11 + $0x338] sm:$0xf0]  ;;  %v2960_v60 = vld [vmem:[#allocation14 + $0xe4] sm:$0xf0]  ;;  %v2698_v39 = vld [vmem:[#allocation14 + $0x150] sm:$0xf] }
  0xe4   :  { %1325 = vmatpush.bf16.msra.mxu2 %v2271_v53  ;;  %1307 = vmatmul.bf16.vlgmr.msra.gmra.mxu0 %v3392_v34  ;;  %v2431_v31 = vor.u32 %v2904_v21, %v2428_v24  ;;  %v2942_v55 = vld [vmem:[#allocation14 + $0x54] sm:$0xf0]  ;;  %v2940_v62 = vld [vmem:[#allocation14 + $0x44] sm:$0xf0]  ;;  %v2643_v63 = vor.u32 %v2960_v60, %v2642_v59  ;;  %v2714_v21 = vld [vmem:[#allocation14 + $0x170] sm:$0xf] }
  0xe5   :  { %1351 = vmatpush.bf16.msrb.mxu0 %v2527_v16  ;;  %v2188_v16 = vld [vmem:[#allocation11 + $0x158] sm:$0xf0]  ;;  %v2571_v58 = vor.u32 %v2942_v55, %v2570_v54  ;;  %v2937_v54 = vld [vmem:[#allocation14 + $0x34] sm:$0xf]  ;;  %v2556_v55 = vld [vmem:[#allocation14 + $0x38] sm:$0xf0] }
  0xe6   :  { %1314 = vmatpush.bf16.msra.mxu1 %v2111_v28  ;;  %1294 = vmatmul.bf16.vlgmr.msrb.gmra.mxu3 %v3402_v51  ;;  %v2191_v53 = vor.u32 %v2844_v15, %v2188_v16  ;;  %v2840_v28 = vld [vmem:[#allocation11 + $0x12c] sm:$0xf]  ;;  %v2958_v10 = vld [vmem:[#allocation14 + $0xd4] sm:$0xf0]  ;;  %v2945_v16 = vld [vmem:[#allocation14 + $0x74] sm:$0xf] }
  0xe7   :  { %1338 = vmatpush.bf16.msra.mxu3 %v2399_v25  ;;  %v2586_v25 = vld [vmem:[#allocation14 + $0x70] sm:$0xf]  ;;  %v2954_v20 = vld [vmem:[#allocation14 + $0xb4] sm:$0xf0]  ;;  %v2652_v59 = vld [vmem:[#allocation14 + $0xf8] sm:$0xf0] }
  0xe8   :  { %1326 = vmatpush.bf16.msra.mxu2 %v2255_v37  ;;  %v2587_v37 = vor.u32 %v2946_v26, %v2586_v25  ;;  %v2978_v22 = vld [vmem:[#allocation14 + $0x174] sm:$0xf0]  ;;  %v2580_v25 = vld [vmem:[#allocation14 + $0x68] sm:$0xf0]  ;;  %v2682_v60 = vld [vmem:[#allocation14 + $0x130] sm:$0xf] }
  0xe9   :  { %1352 = vmatpush.bf16.msrb.mxu0 %v2511_v29  ;;  %v2172_v29 = vld [vmem:[#allocation11 + $0x138] sm:$0xf0]  ;;  %v2715_v24 = vor.u32 %v2978_v22, %v2714_v21  ;;  %v2628_v22 = vld [vmem:[#allocation14 + $0xc8] sm:$0xf0] }
  0xea   :  { %1315 = vmatpush.bf16.msra.mxu1 %v2095_v41  ;;  %v2303_v41 = vor.u32 %v2872_v32, %v2300_v33  ;;  %v2941_v32 = vld [vmem:[#allocation14 + $0x54] sm:$0xf]  ;;  %v2572_v33 = vld [vmem:[#allocation14 + $0x58] sm:$0xf0] }
  0xeb   :  { %1339 = vmatpush.bf16.msra.mxu3 %v2383_v38  ;;  %v2175_v38 = vor.u32 %v2840_v28, %v2172_v29  ;;  %v2952_v28 = vld [vmem:[#allocation14 + $0xa4] sm:$0xf0]  ;;  %v2706_v29 = vld [vmem:[#allocation14 + $0x160] sm:$0xf]  ;;  %v2575_v36 = vor.u32 %v2941_v32, %v2572_v33 }
  0xec   :  { %1327 = vmatpush.bf16.msra.mxu2 %v2239_v50  ;;  %v2962_v50 = vld [vmem:[#allocation14 + $0xf4] sm:$0xf0] }
  0xed   :  { %1353 = vmatpush.bf16.msrb.mxu0 %v2495_v42  ;;  %v2836_v42 = vld [vmem:[#allocation11 + $0x10c] sm:$0xf] }
  0xee   :  { %1316 = vmatpush.bf16.msra.mxu1 %v2079_v56  ;;  %v2287_v56 = vor.u32 %v2868_v46, %v2284_v47  ;;  %v2594_v47 = vld [vmem:[#allocation14 + $0x80] sm:$0xf] }
  0xef   :  { %1340 = vmatpush.bf16.msra.mxu3 %v2367_v52  ;;  %v2159_v52 = vor.u32 %v2836_v42, %v2156_v43  ;;  %v2939_v42 = vld [vmem:[#allocation14 + $0x44] sm:$0xf]  ;;  %v2564_v43 = vld [vmem:[#allocation14 + $0x48] sm:$0xf0] }
  0xf0   :  { %1328 = vmatpush.bf16.msra.mxu2 %v2223_v0  ;;  %v2563_v0 = vor.u32 %v2940_v62, %v2562_v61  ;;  %v2567_v46 = vor.u32 %v2939_v42, %v2564_v43  ;;  %v2970_v62 = vld [vmem:[#allocation14 + $0x134] sm:$0xf0] }
  0xf1   :  { %1354 = vmatpush.bf16.msrb.mxu0 %v2479_v57  ;;  %v2651_v57 = vor.u32 %v2962_v50, %v2650_v49  ;;  %v2690_v49 = vld [vmem:[#allocation14 + $0x140] sm:$0xf] }
  0xf2   :  { %1317 = vmatpush.bf16.msra.mxu1 %v2063_v4  ;;  %v2936_v4 = vld [vmem:[#allocation14 + $0x24] sm:$0xf0] }
  0xf3   :  { %1341 = vmatpush.bf16.msra.mxu3 %v2351_v1  ;;  %v2938_v1 = vld [vmem:[#allocation14 + $0x34] sm:$0xf0] }
  0xf4   :  { %1329 = vmatpush.bf16.msra.mxu2 %v2207_v13 }
  0xf5   :  { %1355 = vmatpush.bf16.msrb.mxu0 %v2463_v5  ;;  %v2547_v5 = vor.u32 %v2936_v4, %v2546_v3  ;;  %v2644_v3 = vld [vmem:[#allocation14 + $0xe8] sm:$0xf0] }
  0xf6   :  { %1318 = vmatpush.bf16.msra.mxu1 %v2047_v17  ;;  %v2588_v17 = vld [vmem:[#allocation14 + $0x78] sm:$0xf0] }
  0xf7   :  { %1342 = vmatpush.bf16.msra.mxu3 %v2335_v14  ;;  %v2956_v14 = vld [vmem:[#allocation14 + $0xc4] sm:$0xf0]  ;;  %v2591_v19 = vor.u32 %v2945_v16, %v2588_v17  ;;  %v2931_v17 = vld [vmem:[#allocation14 + $0x4] sm:$0xf] }
  0xf8   :  { %1330 = vmatpush.bf16.msra.mxu2 %v2191_v53  ;;  %v2627_v15 = vor.u32 %v2956_v14, %v2626_v12  ;;  %v2943_v53 = vld [vmem:[#allocation14 + $0x64] sm:$0xf]  ;;  %v2666_v14 = vld [vmem:[#allocation14 + $0x110] sm:$0xf] }
  0xf9   :  { %1356 = vmatpush.bf16.msrb.mxu0 %v2447_v18  ;;  %v2618_v18 = vld [vmem:[#allocation14 + $0xb0] sm:$0xf]  ;;  %v2583_v26 = vor.u32 %v2943_v53, %v2580_v25  ;;  %v2658_v53 = vld [vmem:[#allocation14 + $0x100] sm:$0xf]  ;;  %v2964_v25 = vld [vmem:[#allocation14 + $0x104] sm:$0xf0] }
  0xfa   :  { %1319 = vmatpush.bf16.msra.mxu1 %v2031_v30  ;;  %v2619_v23 = vor.u32 %v2954_v20, %v2618_v18  ;;  %v2532_v18 = vld [vmem:[#allocation14 + $0x8] sm:$0xf0] }
  0xfb   :  { %1343 = vmatpush.bf16.msra.mxu3 %v2319_v27  ;;  %v2610_v27 = vld [vmem:[#allocation14 + $0xa0] sm:$0xf]  ;;  %v2535_v21 = vor.u32 %v2931_v17, %v2532_v18  ;;  %v2746_v17 = vld [vmem:[#allocation14 + $0x1b0] sm:$0xf]  ;;  %v2986_v18 = vld [vmem:[#allocation14 + $0x1b4] sm:$0xf0] }
  0xfc   :  { %1331 = vmatpush.bf16.msra.mxu2 %v2175_v38  ;;  %v2611_v30 = vor.u32 %v2952_v28, %v2610_v27  ;;  %v2950_v38 = vld [vmem:[#allocation14 + $0x94] sm:$0xf0]  ;;  %v2659_v28 = vor.u32 %v2964_v25, %v2658_v53 }
  0xfd   :  { %1357 = vmatpush.bf16.msrb.mxu0 %v2431_v31  ;;  %1320 = vmatmul.bf16.vlgmr.msra.gmra.mxu1 %v3389_v7  ;;  %v2554_v7 = vld [vmem:[#allocation14 + $0x30] sm:$0xf]  ;;  %v2976_v31 = vld [vmem:[#allocation14 + $0x164] sm:$0xf0] }
  0xfe   :  { %1762 = vmatpush.bf16.msrb.mxu1 %v2587_v37  ;;  %v2555_v2 = vor.u32 %v2938_v1, %v2554_v7  ;;  %v2707_v35 = vor.u32 %v2976_v31, %v2706_v29  ;;  %v2602_v37 = vld [vmem:[#allocation14 + $0x90] sm:$0xf]  ;;  %v2548_v7 = vld [vmem:[#allocation14 + $0x28] sm:$0xf0]  ;;  %v2959_v1 = vld [vmem:[#allocation14 + $0xe4] sm:$0xf] }
  0xff   :  { %1344 = vmatpush.bf16.msra.mxu3 %v2303_v41  ;;  %v2603_v40 = vor.u32 %v2950_v38, %v2602_v37  ;;  %v2974_v41 = vld [vmem:[#allocation14 + $0x154] sm:$0xf0]  ;;  %v2647_v4 = vor.u32 %v2959_v1, %v2644_v3  ;;  %v2620_v31 = vld [vmem:[#allocation14 + $0xb8] sm:$0xf0]  ;;  %v2770_v37 = vld [vmem:[#allocation14 + $0x1e0] sm:$0xf] }
 0x100   :  { %1332 = vmatpush.bf16.msra.mxu2 %v2159_v52  ;;  %v2972_v52 = vld [vmem:[#allocation14 + $0x144] sm:$0xf0]  ;;  %v2994_v29 = vld [vmem:[#allocation14 + $0x1f4] sm:$0xf0]  ;;  %v2754_v3 = vld [vmem:[#allocation14 + $0x1c0] sm:$0xf] }
 0x101   :  { %1358 = vmatpush.bf16.msrb.mxu0 %v2415_v44  ;;  %v2699_v44 = vor.u32 %v2974_v41, %v2698_v39 }
 0x102   :  { %1763 = vmatpush.bf16.msrb.mxu1 %v2579_v48  ;;  %v2948_v48 = vld [vmem:[#allocation14 + $0x84] sm:$0xf0] }
 0x103   :  { %1345 = vmatpush.bf16.msra.mxu3 %v2287_v56  ;;  %1333 = vmatmul.bf16.vlgmr.msra.gmra.mxu2 %v3398_v45  ;;  %v2635_v45 = vor.u32 %v2958_v10, %v2634_v8  ;;  %v2595_v50 = vor.u32 %v2948_v48, %v2594_v47  ;;  %v2691_v56 = vor.u32 %v2972_v52, %v2690_v49  ;;  %v2540_v10 = vld [vmem:[#allocation14 + $0x18] sm:$0xf0]  ;;  %v2975_v47 = vld [vmem:[#allocation14 + $0x164] sm:$0xf]  ;;  %v2708_v52 = vld [vmem:[#allocation14 + $0x168] sm:$0xf0] }
 0x104   :  { %1359 = vmatmul.bf16.vlgmr.msrb.gmra.mxu0 %v3392_v34  ;;  %1775 = vmatpush.bf16.msrb.mxu2 %v2651_v57  ;;  %v2934_v34 = vld [vmem:[#allocation14 + $0x14] sm:$0xf0]  ;;  %v2559_v57 = vor.u32 %v2937_v54, %v2556_v55  ;;  %v2711_v54 = vor.u32 %v2975_v47, %v2708_v52  ;;  %v2993_v52 = vld [vmem:[#allocation14 + $0x1f4] sm:$0xf] }
 0x105   :  { %v2539_v9 = vor.u32 %v2934_v34, %v2538_v6  ;;  %v2968_v6 = vld [vmem:[#allocation14 + $0x124] sm:$0xf0] }
 0x106   :  { %1764 = vmatpush.bf16.msrb.mxu1 %v2571_v58  ;;  %1346 = vmatmul.bf16.vlgmr.msra.gmra.mxu3 %v3402_v51  ;;  %v2932_v51 = vld [vmem:[#allocation14 + $0x4] sm:$0xf0]  ;;  %v2961_v58 = vld [vmem:[#allocation14 + $0xf4] sm:$0xf] }
 0x107   :  { %v2531_v13 = vor.u32 %v2932_v51, %v2530_v11  ;;  %1788 = vmatpush.bf16.msrb.mxu3 %v2715_v24  ;;  %v2655_v61 = vor.u32 %v2961_v58, %v2652_v59  ;;  %v2636_v51 = vld [vmem:[#allocation14 + $0xd8] sm:$0xf0]  ;;  %v2990_v58 = vld [vmem:[#allocation14 + $0x1d4] sm:$0xf0] }
 0x108   :  { %1776 = vmatpush.bf16.msrb.mxu2 %v2643_v63  ;;  %v2683_v63 = vor.u32 %v2970_v62, %v2682_v60  ;;  %v2949_v60 = vld [vmem:[#allocation14 + $0x94] sm:$0xf] }
 0x109   :  { %v2973_v62 = vld [vmem:[#allocation14 + $0x154] sm:$0xf] }
 0x10a   :  { %1765 = vmatpush.bf16.msrb.mxu1 %v2563_v0  ;;  %v2935_v0 = vld [vmem:[#allocation14 + $0x24] sm:$0xf] }
 0x10b   :  { %1789 = vmatpush.bf16.msrb.mxu3 %v2707_v35  ;;  %v2977_v35 = vld [vmem:[#allocation14 + $0x174] sm:$0xf] }
 0x10c   :  { %1777 = vmatpush.bf16.msrb.mxu2 %v2635_v45  ;;  %v2957_v45 = vld [vmem:[#allocation14 + $0xd4] sm:$0xf] }
 0x10d   :  { %v2639_v12 = vor.u32 %v2957_v45, %v2636_v51 }
 0x10e   :  { %1766 = vmatpush.bf16.msrb.mxu1 %v2555_v2  ;;  %v2551_v2 = vor.u32 %v2935_v0, %v2548_v7  ;;  %v2700_v7 = vld [vmem:[#allocation14 + $0x158] sm:$0xf0] }
 0x10f   :  { %1790 = vmatpush.bf16.msrb.mxu3 %v2699_v44  ;;  %v2951_v44 = vld [vmem:[#allocation14 + $0xa4] sm:$0xf]  ;;  %v2703_v1 = vor.u32 %v2973_v62, %v2700_v7 }
 0x110   :  { %1778 = vmatpush.bf16.msrb.mxu2 %v2627_v15  ;;  %v2966_v15 = vld [vmem:[#allocation14 + $0x114] sm:$0xf0]  ;;  %v2991_v62 = vld [vmem:[#allocation14 + $0x1e4] sm:$0xf] }
 0x111   :  { %v2667_v16 = vor.u32 %v2966_v15, %v2666_v14 }
 0x112   :  { %1767 = vmatpush.bf16.msrb.mxu1 %v2547_v5  ;;  %v2674_v5 = vld [vmem:[#allocation14 + $0x120] sm:$0xf] }
 0x113   :  { %1791 = vmatpush.bf16.msrb.mxu3 %v2691_v56  ;;  %v2675_v8 = vor.u32 %v2968_v6, %v2674_v5 }
 0x114   :  { %1779 = vmatpush.bf16.msrb.mxu2 %v2619_v23 }
 0x116   :  { %1768 = vmatpush.bf16.msrb.mxu1 %v2539_v9  ;;  %v2933_v9 = vld [vmem:[#allocation14 + $0x14] sm:$0xf] }
 0x117   :  { %1792 = vmatpush.bf16.msrb.mxu3 %v2683_v63  ;;  %v2543_v11 = vor.u32 %v2933_v9, %v2540_v10  ;;  %v2596_v9 = vld [vmem:[#allocation14 + $0x88] sm:$0xf0]  ;;  %v2971_v10 = vld [vmem:[#allocation14 + $0x144] sm:$0xf] }
 0x118   :  { %1780 = vmatpush.bf16.msrb.mxu2 %v2611_v30  ;;  %v2953_v30 = vld [vmem:[#allocation14 + $0xb4] sm:$0xf] }
 0x119   :  { %v2623_v33 = vor.u32 %v2953_v30, %v2620_v31 }
 0x11a   :  { %1769 = vmatpush.bf16.msrb.mxu1 %v2531_v13  ;;  %v3422_v13 = vld [vmem:[#allocation13] sm:$0xf] }
 0x11b   :  { %1793 = vmatpush.bf16.msrb.mxu3 %v2675_v8  ;;  %v508_v23 = vperm.slane %v3422_v13, 0  ;;  %v2947_v8 = vld [vmem:[#allocation14 + $0x84] sm:$0xf]  ;;  %v509_v15 = vperm.slane %v3422_v13, 1 }
 0x11c   :  { %1781 = vmatpush.bf16.msrb.mxu2 %v2603_v40  ;;  %v2992_v40 = vld [vmem:[#allocation14 + $0x1e4] sm:$0xf0]  ;;  %v2599_v51 = vor.u32 %v2947_v8, %v2596_v9  ;;  %v2987_v9 = vld [vmem:[#allocation14 + $0x1c4] sm:$0xf] }
 0x11d   :  { %v2771_v41 = vor.u32 %v2992_v40, %v2770_v37  ;;  %v2668_v40 = vld [vmem:[#allocation14 + $0x118] sm:$0xf0] }
 0x11e   :  { %1814 = vmatpush.bf16.msra.mxu1 %v2591_v19  ;;  %v2955_v19 = vld [vmem:[#allocation14 + $0xc4] sm:$0xf] }
 0x11f   :  { %v2631_v24 = vor.u32 %v2955_v19, %v2628_v22  ;;  %1794 = vmatpush.bf16.msrb.mxu3 %v2667_v16  ;;  %v2747_v19 = vor.u32 %v2986_v18, %v2746_v17  ;;  %v2738_v22 = vld [vmem:[#allocation14 + $0x1a0] sm:$0xf]  ;;  %v2983_v18 = vld [vmem:[#allocation14 + $0x1a4] sm:$0xf] }
 0x120   :  { %1782 = vmatpush.bf16.msrb.mxu2 %v2595_v50 }
 0x122   :  { %1815 = vmatpush.bf16.msra.mxu1 %v2583_v26  ;;  %v2778_v26 = vld [vmem:[#allocation14 + $0x1f0] sm:$0xf] }
 0x123   :  { %v2779_v32 = vor.u32 %v2994_v29, %v2778_v26  ;;  %1795 = vmatpush.bf16.msrb.mxu3 %v2659_v28  ;;  %v2967_v28 = vld [vmem:[#allocation14 + $0x124] sm:$0xf]  ;;  %v2676_v29 = vld [vmem:[#allocation14 + $0x128] sm:$0xf0] }
 0x124   :  { %1827 = vmatpush.bf16.msra.mxu2 %v2655_v61  ;;  %v2604_v61 = vld [vmem:[#allocation14 + $0x98] sm:$0xf0] }
 0x125   :  { %1801 = vmatpush.bf16.msra.mxu0 %v2779_v32  ;;  %v2607_v0 = vor.u32 %v2949_v60, %v2604_v61  ;;  %v2679_v32 = vor.u32 %v2967_v28, %v2676_v29  ;;  %v510_v60 = vperm.slane %v3422_v13, 2  ;;  %v511_v29 = vperm.slane %v3422_v13, 3 }
 0x126   :  { %1816 = vmatpush.bf16.msra.mxu1 %v2575_v36  ;;  %v2716_v36 = vld [vmem:[#allocation14 + $0x178] sm:$0xf0] }
 0x127   :  { %v2719_v39 = vor.u32 %v2977_v35, %v2716_v36  ;;  %v2982_v35 = vld [vmem:[#allocation14 + $0x194] sm:$0xf0] }
 0x128   :  { %1828 = vmatpush.bf16.msra.mxu2 %v2647_v4  ;;  %v2988_v4 = vld [vmem:[#allocation14 + $0x1c4] sm:$0xf0] }
 0x129   :  { %1840 = vmatpush.bf16.msra.mxu3 %v2719_v39  ;;  %1802 = vmatpush.bf16.msra.mxu0 %v2771_v41  ;;  %v2965_v39 = vld [vmem:[#allocation14 + $0x114] sm:$0xf] }
 0x12a   :  { %1817 = vmatpush.bf16.msra.mxu1 %v2567_v46  ;;  %v2612_v46 = vld [vmem:[#allocation14 + $0xa8] sm:$0xf0] }
 0x12b   :  { %v2615_v50 = vor.u32 %v2951_v44, %v2612_v46  ;;  %v2980_v44 = vld [vmem:[#allocation14 + $0x184] sm:$0xf0] }
 0x12c   :  { %1829 = vmatpush.bf16.msra.mxu2 %v2639_v12  ;;  %v2692_v12 = vld [vmem:[#allocation14 + $0x148] sm:$0xf0] }
 0x12d   :  { %1841 = vmatpush.bf16.msra.mxu3 %v2711_v54  ;;  %v2695_v14 = vor.u32 %v2971_v10, %v2692_v12  ;;  %v2756_v10 = vld [vmem:[#allocation14 + $0x1c8] sm:$0xf0]  ;;  %v2985_v12 = vld [vmem:[#allocation14 + $0x1b4] sm:$0xf] }
 0x12e   :  { %1818 = vmatpush.bf16.msra.mxu1 %v2559_v57  ;;  %v2762_v57 = vld [vmem:[#allocation14 + $0x1d0] sm:$0xf] }
 0x12f   :  { %v2763_v59 = vor.u32 %v2990_v58, %v2762_v57  ;;  %v2780_v58 = vld [vmem:[#allocation14 + $0x1f8] sm:$0xf0] }
 0x130   :  { %1830 = vmatpush.bf16.msra.mxu2 %v2631_v24  ;;  %v2984_v24 = vld [vmem:[#allocation14 + $0x1a4] sm:$0xf0] }
 0x131   :  { %1803 = vmatpush.bf16.msra.mxu0 %v2763_v59  ;;  %1842 = vmatpush.bf16.msra.mxu3 %v2703_v1  ;;  %v2739_v53 = vor.u32 %v2984_v24, %v2738_v22  ;;  %v2783_v59 = vor.u32 %v2993_v52, %v2780_v58  ;;  %v2989_v1 = vld [vmem:[#allocation14 + $0x1d4] sm:$0xf] }
 0x132   :  { %1819 = vmatpush.bf16.msra.mxu1 %v2551_v2  ;;  %v2981_v22 = vld [vmem:[#allocation14 + $0x194] sm:$0xf] }
 0x134   :  { %1831 = vmatpush.bf16.msra.mxu2 %v2623_v33  ;;  %v2730_v33 = vld [vmem:[#allocation14 + $0x190] sm:$0xf] }
 0x135   :  { %1843 = vmatpush.bf16.msra.mxu3 %v2695_v14  ;;  %v2731_v37 = vor.u32 %v2982_v35, %v2730_v33  ;;  %v2748_v14 = vld [vmem:[#allocation14 + $0x1b8] sm:$0xf0] }
 0x136   :  { %1820 = vmatpush.bf16.msra.mxu1 %v2543_v11  ;;  %v2751_v17 = vor.u32 %v2985_v12, %v2748_v14 }
 0x138   :  { %1832 = vmatpush.bf16.msra.mxu2 %v2615_v50  ;;  %v2660_v50 = vld [vmem:[#allocation14 + $0x108] sm:$0xf0] }
 0x13a   :  { %v1165_v34 = vpop.f32.mrf.mxu1  ;;  %1821 = vmatpush.bf16.msra.mxu1 %v2535_v21  ;;  %v2684_v21 = vld [vmem:[#allocation14 + $0x138] sm:$0xf0] }
 0x13b   :  { %v1166_v38 = vadd.f32 %v1165_v34, %v508_v23  ;;  %v2755_v34 = vor.u32 %v2988_v4, %v2754_v3 }
 0x13c   :  { %1833 = vmatpush.bf16.msra.mxu2 %v2607_v0 }
 0x13d   :  { %1804 = vmatpush.bf16.msra.mxu0 %v2755_v34 }
 0x140   :  { %1834 = vmatpush.bf16.msra.mxu2 %v2599_v51 }
 0x141   :  { %v1204_v20 = vpop.f32.mrf.mxu0  ;;  %1805 = vmatpush.bf16.msra.mxu0 %v2747_v19  ;;  %v2740_v19 = vld [vmem:[#allocation14 + $0x1a8] sm:$0xf0] }
 0x142   :  { %v1167_v27 = vpop.f32.mrf.mxu1 }
 0x145   :  { %1806 = vmatpush.bf16.msra.mxu0 %v2739_v53 }
 0x146   :  { %v1178_v42 = vpop.f32.mrf.mxu2 }
 0x147   :  { %v1179_v48 = vadd.f32 %v1178_v42, %v1166_v38  ;;  %v2671_v42 = vor.u32 %v2965_v39, %v2668_v40 }
 0x149   :  { %v1206_v43 = vpop.f32.mrf.mxu0  ;;  %v1191_v49 = vpop.f32.mrf.mxu3  ;;  %1807 = vmatpush.bf16.msra.mxu0 %v2731_v37 }
 0x14a   :  { %v1192_v55 = vadd.f32 %v1191_v49, %v1179_v48  ;;  %v1217_v56 = vpop.f32.mrf.mxu1  ;;  %v2722_v43 = vld [vmem:[#allocation14 + $0x180] sm:$0xf]  ;;  %v2963_v49 = vld [vmem:[#allocation14 + $0x104] sm:$0xf] }
 0x14b   :  { %v1218_v25 = vadd.f32 %v1217_v56, %v509_v15  ;;  %v2723_v46 = vor.u32 %v2980_v44, %v2722_v43  ;;  %v2663_v57 = vor.u32 %v2963_v49, %v2660_v50 }
 0x14c   :  { %v1205_v63 = vadd.f32 %v1204_v20, %v1192_v55  ;;  %v2969_v20 = vld [vmem:[#allocation14 + $0x134] sm:$0xf] }
 0x14d   :  { %v2687_v23 = vor.u32 %v2969_v20, %v2684_v21  ;;  %1808 = vmatpush.bf16.msra.mxu0 %v2723_v46  ;;  %v2743_v21 = vor.u32 %v2983_v18, %v2740_v19 }
 0x14e   :  { %v1364_v2 = vmax.f32 %v1205_v63, 0.0  ;;  %v1180_v5 = vpop.f32.mrf.mxu2  ;;  %v2772_v63 = vld [vmem:[#allocation14 + $0x1e8] sm:$0xf0] }
 0x14f   :  { %1844 = vmatpush.bf16.msra.mxu3 %v2687_v23  ;;  %v2775_v0 = vor.u32 %v2991_v62, %v2772_v63  ;;  %v2732_v23 = vld [vmem:[#allocation14 + $0x198] sm:$0xf0] }
 0x150   :  { %v1368_v45 = vpack.c.bf16 %v1364_v2, %v1364_v2  ;;  %v2764_v2 = vld [vmem:[#allocation14 + $0x1d8] sm:$0xf0]  ;;  %v2735_v24 = vor.u32 %v2981_v22, %v2732_v23 }
 0x151   :  { %v1256_v6 = vpop.f32.mrf.mxu0  ;;  %v1193_v11 = vpop.f32.mrf.mxu3  ;;  %1853 = vmatpush.bf16.msrb.mxu0 %v2783_v59  ;;  %v2767_v5 = vor.u32 %v2989_v1, %v2764_v2 }
 0x152   :  { %1770 = vmatmul.bf16.vlgmr.msrb.gmra.mxu1 %v1368_v45  ;;  %v1219_v16 = vpop.f32.mrf.mxu1 }
 0x153   :  { %1845 = vmatpush.bf16.msra.mxu3 %v2679_v32 }
 0x155   :  { %1854 = vmatpush.bf16.msrb.mxu0 %v2775_v0 }
 0x156   :  { %v1230_v26 = vpop.f32.mrf.mxu2 }
 0x157   :  { %v1231_v30 = vadd.f32 %v1230_v26, %v1218_v25  ;;  %1846 = vmatpush.bf16.msra.mxu3 %v2671_v42  ;;  %v2979_v25 = vld [vmem:[#allocation14 + $0x184] sm:$0xf]  ;;  %v2724_v26 = vld [vmem:[#allocation14 + $0x188] sm:$0xf0] }
 0x159   :  { %v1258_v27 = vpop.f32.mrf.mxu0  ;;  %v1243_v31 = vpop.f32.mrf.mxu3  ;;  %1855 = vmatpush.bf16.msrb.mxu0 %v2767_v5 }
 0x15a   :  { %v1244_v36 = vadd.f32 %v1243_v31, %v1231_v30  ;;  %v1269_v38 = vpop.f32.mrf.mxu1  ;;  %v2727_v27 = vor.u32 %v2979_v25, %v2724_v26 }
 0x15b   :  { %1847 = vmatpush.bf16.msra.mxu3 %v2663_v57  ;;  %v1270_v7 = vadd.f32 %v1269_v38, %v510_v60 }
 0x15c   :  { %v1257_v41 = vadd.f32 %v1256_v6, %v1244_v36 }
 0x15e   :  { %v1365_v47 = vmax.f32 %v1257_v41, 0.0  ;;  %v1232_v48 = vpop.f32.mrf.mxu2 }
 0x160   :  { %v1369_v54 = vpack.c.bf16 %v1365_v47, %v1365_v47 }
 0x161   :  { %v1245_v55 = vpop.f32.mrf.mxu3  ;;  %v1308_v56 = vpop.f32.mrf.mxu0 }
 0x162   :  { %1783 = vmatmul.bf16.vlgmr.msrb.gmra.mxu2 %v1369_v54  ;;  %1822 = vmatmul.bf16.vlgmr.msra.gmra.mxu1 %v1368_v45  ;;  %v1271_v61 = vpop.f32.mrf.mxu1  ;;  %v2759_v45 = vor.u32 %v2987_v9, %v2756_v10  ;;  %v1436_v55 = vld [vmem:[%s3446_s9] sm:$0x3]  ;;  %s3293_s9 = smov [#allocation17]  }
 0x163   :  { %s1922_s10 = sshll.u32 %s3293_s9, 4  ;;  %s1923_s10 = int_to_ptr.vmem [resolvable:$true] %s1922_s10 }
 0x164   :  { %1856 = vmatpush.bf16.msrb.mxu0 %v2759_v45 }
 0x166   :  { %v1282_v3 = vpop.f32.mrf.mxu2 }
 0x167   :  { %v1283_v6 = vadd.f32 %v1282_v3, %v1270_v7  ;;  %v1439_v7 = vperm.slane %v1436_v55, 1 }
 0x168   :  { %1857 = vmatpush.bf16.msrb.mxu0 %v2751_v17 }
 0x169   :  { %v1295_v4 = vpop.f32.mrf.mxu3  ;;  %v1310_v34 = vpop.f32.mrf.mxu0 }
 0x16a   :  { %v1296_v8 = vadd.f32 %v1295_v4, %v1283_v6 }
 0x16c   :  { %v1309_v11 = vadd.f32 %v1308_v56, %v1296_v8  ;;  %1858 = vmatpush.bf16.msrb.mxu0 %v2743_v21  ;;  %v1438_v56 = vperm.slane %v1436_v55, 0 }
 0x16e   :  { %v1366_v51 = vmax.f32 %v1309_v11, 0.0  ;;  %v1284_v15 = vpop.f32.mrf.mxu2 }
 0x170   :  { %v1370_v20 = vpack.c.bf16 %v1366_v51, %v1366_v51  ;;  %1859 = vmatpush.bf16.msrb.mxu0 %v2735_v24 }
 0x171   :  { %v1297_v16 = vpop.f32.mrf.mxu3 }
 0x172   :  { %1835 = vmatmul.bf16.vlgmr.msra.gmra.mxu2 %v1369_v54  ;;  %1796 = vmatmul.bf16.vlgmr.msrb.gmra.mxu3 %v1370_v20 }
 0x174   :  { %1860 = vmatpush.bf16.msrb.mxu0 %v2727_v27 }
 0x17a   :  { %v1321_v53 = vpop.f32.mrf.mxu1 }
 0x17b   :  { %v1322_v31 = vadd.f32 %v1321_v53, %v511_v29 }
 0x181   :  { %v1360_v28 = vpop.f32.mrf.mxu0 }
 0x182   :  { %v1323_v30 = vpop.f32.mrf.mxu1  ;;  %1848 = vmatmul.bf16.vlgmr.msra.gmra.mxu3 %v1370_v20 }
 0x186   :  { %v1334_v32 = vpop.f32.mrf.mxu2 }
 0x187   :  { %v1335_v35 = vadd.f32 %v1334_v32, %v1322_v31 }
 0x189   :  { %v1362_v33 = vpop.f32.mrf.mxu0  ;;  %v1347_v36 = vpop.f32.mrf.mxu3 }
 0x18a   :  { %v1348_v37 = vadd.f32 %v1347_v36, %v1335_v35 }
 0x18c   :  { %v1361_v38 = vadd.f32 %v1360_v28, %v1348_v37 }
 0x18e   :  { %v1367_v39 = vmax.f32 %v1361_v38, 0.0  ;;  %v1336_v40 = vpop.f32.mrf.mxu2 }
 0x190   :  { %v1371_v41 = vpack.c.bf16 %v1367_v39, %v1367_v39 }
 0x191   :  { %v1349_v42 = vpop.f32.mrf.mxu3 }
 0x192   :  { %1809 = vmatmul.bf16.vlgmr.msra.gmra.mxu0 %v1371_v41 }
 0x1a2   :  { %1861 = vmatmul.bf16.vlgmr.msrb.gmra.mxu0 %v1371_v41 }
 0x1cf   :  { %v1771_v13 = vpop.f32.mrf.mxu1 }
 0x1d0   :  { %v1772_v58 = vadd.f32 %v1771_v13, %v1438_v56 }
 0x1d7   :  { %v1773_v43 = vpop.f32.mrf.mxu1 }
 0x1df   :  { %v1823_v44 = vpop.f32.mrf.mxu1 }
 0x1e0   :  { %v1824_v3 = vadd.f32 %v1823_v44, %v1439_v7 }
 0x1e5   :  { %v1784_v46 = vpop.f32.mrf.mxu2 }
 0x1e6   :  { %v1785_v59 = vadd.f32 %v1784_v46, %v1772_v58 }
 0x1e7   :  { %v1825_v47 = vpop.f32.mrf.mxu1 }
 0x1ed   :  { %v1786_v48 = vpop.f32.mrf.mxu2 }
 0x1f5   :  { %v1836_v49 = vpop.f32.mrf.mxu2  ;;  %v1797_v50 = vpop.f32.mrf.mxu3 }
 0x1f6   :  { %v1798_v60 = vadd.f32 %v1797_v50, %v1785_v59  ;;  %v1837_v5 = vadd.f32 %v1836_v49, %v1824_v3 }
 0x1fd   :  { %v1838_v52 = vpop.f32.mrf.mxu2  ;;  %v1799_v54 = vpop.f32.mrf.mxu3 }
 0x205   :  { %v1849_v57 = vpop.f32.mrf.mxu3 }
 0x206   :  { %v1850_v6 = vadd.f32 %v1849_v57, %v1837_v5 }
 0x20d   :  { %v1851_v63 = vpop.f32.mrf.mxu3 }
 0x20f   :  { %v1810_v61 = vpop.f32.mrf.mxu0 }
 0x210   :  { %v1811_v62 = vadd.f32 %v1810_v61, %v1798_v60 }
 0x212   :  { %v2784_v0 = vmul.f32 -1.442695, %v1811_v62 }
 0x214   :  { %3016 = vpow2.f32 %v2784_v0 }
 0x217   :  { %v1812_v1 = vpop.f32.mrf.mxu0 }
 0x21a   :  { %v3017_v2 = vpop.eup %3016 }
 0x21b   :  { %v1872_v4 = vadd.f32 1.0, %v3017_v2 }
 0x21d   :  { %3018 = vrcp.f32 %v1872_v4  ;;  %v1885_v12 = vand.u32 2147483648, %v1872_v4  ;;  %v1883_v15 = vand.u32 2147483647, %v1872_v4  ;;  %vm1879_vm5 = vweird.f32 %v1872_v4 }
 0x21f   :  { %v1862_v34 = vpop.f32.mrf.mxu0  ;;  %v1886_v19 = vor.u32 1.1754944e-38, %v1885_v12  ;;  %vm1884_vm7 = vcmp.eq.f32.partialorder %v1883_v15, 8.507059e+37 }
 0x220   :  { %v1863_v8 = vadd.f32 %v1862_v34, %v1850_v6 }
 0x222   :  { %v2785_v9 = vmul.f32 -1.442695, %v1863_v8 }
 0x223   :  { %v3019_v10 = vpop.eup %3018 }
 0x224   :  { %v1875_v45 = vmul.f32 %v3019_v10, %v1872_v4  ;;  %3020 = vpow2.f32 %v2785_v9  ;;  %vm1880_vm4 = vweird.f32 %v3019_v10 }
 0x225   :  { %vm1881_vm6 = vmor %vm1879_vm5, %vm1880_vm4 }
 0x226   :  { %v1876_v11 = vsub.f32 1.0, %v1875_v45 }
 0x227   :  { %v1864_v51 = vpop.f32.mrf.mxu0 }
 0x228   :  { %v1877_v14 = vmul.f32 %v3019_v10, %v1876_v11 }
 0x22a   :  { %v3021_v16 = vpop.eup %3020  ;;  %v1878_v17 = vadd.f32 %v3019_v10, %v1877_v14 }
 0x22b   :  { %v1873_v18 = vadd.f32 1.0, %v3021_v16 }
 0x22c   :  { %v1882_v20 = vsel %vm1881_vm6, %v3019_v10, %v1878_v17 }
 0x22d   :  { %3022 = vrcp.f32 %v1873_v18  ;;  %v1887_v21 = vsel %vm1884_vm7, %v1886_v19, %v1882_v20  ;;  %v1900_v53 = vand.u32 2147483648, %v1873_v18  ;;  %v1898_v26 = vand.u32 2147483647, %v1873_v18 }
 0x22e   :  { %1904 = vst [vmem:[#allocation17] sm:$0xff] %v1887_v21  ;;  %vm1894_vm9 = vweird.f32 %v1873_v18 }
 0x22f   :  { %v1901_v28 = vor.u32 1.1754944e-38, %v1900_v53  ;;  %vm1899_vm11 = vcmp.eq.f32.partialorder %v1898_v26, 8.507059e+37 }
 0x233   :  { %v3023_v22 = vpop.eup %3022 }
 0x234   :  { %v1890_v23 = vmul.f32 %v3023_v22, %v1873_v18  ;;  %vm1895_vm8 = vweird.f32 %v3023_v22 }
 0x235   :  { %vm1896_vm10 = vmor %vm1894_vm9, %vm1895_vm8 }
 0x236   :  { %v1891_v24 = vsub.f32 1.0, %v1890_v23 }
 0x238   :  { %v1892_v25 = vmul.f32 %v3023_v22, %v1891_v24 }
 0x23a   :  { %v1893_v27 = vadd.f32 %v3023_v22, %v1892_v25 }
 0x23c   :  { %v1897_v29 = vsel %vm1896_vm10, %v3023_v22, %v1893_v27 }
 0x23d   :  { %v1902_v30 = vsel %vm1899_vm11, %v1901_v28, %v1897_v29 }
 0x23e   :  { %1905 = vst [vmem:[#allocation17 + $0x8] sm:$0xff] %v1902_v30 }
 0x23f   :  { %1927 = dma.vmem_to_hbm [thread:$0]  %s1923_s10, 256, %s1925_s24, [#allocation18]  }
 0x240   :  { %3274 = dma.done.wait [#allocation4], 128  }
 0x241   :  { %3275 = vsyncadd [#allocation4], 4294967168 }
 0x242   :  { %3276 = dma.done.wait [#allocation18], 256  }
 0x243   :  { %3277 = vsyncadd [#allocation18], 4294967040 }
 0x244   :  { %1936 = vsyncpa [#allocation3], 1 }
 0x245   :  { %1937 = vsyncpa [#allocation6], 1 }
 0x246   :  { %1938 = vsyncpa [#allocation9], 1 }
 0x247   :  { %1939 = vsyncpa [#allocation12], 1 }
 0x248   :  { %1940 = vsyncpa [#allocation15], 1 }
 0x249   :  { %1941 = vsyncpa [#allocation4], 1 }
 0x24a   :  { %1942 = vsyncpa [#allocation18], 1 }

</bundles_post_ra>
